<compile_context>
chip_gen: v7x
topology: tpu7x:2x2x1
jax: 0.10.0
libtpu: 0.0.40
codegen_flags: <defaults>
</compile_context>

<pallas_src>
from functools import partial

import jax
import jax.numpy as jnp
from jax.experimental import pallas as pl
from jax.experimental.pallas import tpu as pltpu


def _round_up(n, m):
    return ((n + m - 1) // m) * m


# -----------------------------------------------------------------------------
# Kernel: one grid step == one decode time step.  Weights / enc are resident.
# -----------------------------------------------------------------------------
def _attention_decoder_kernel(
    x_ref,      # (B, I)    bf16  current-step input (time dim squeezed by BlockSpec)
    h0_ref,     # (B, Hp)   f32   initial hidden (read only at t == 0)
    enc_ref,    # (B, S, Hp) bf16 encoder outputs, batch-first, resident
    wih_ref,    # (I, 3Hp)  bf16  GRU input weights, gates r|z|n, each Hp-aligned
    whh_ref,    # (Hp, 3Hp) bf16  GRU hidden weights
    bih_ref,    # (1, 3Hp)  f32
    bhh_ref,    # (1, 3Hp)  f32
    wa_ref,     # (Hp, Hp)  bf16  attention "general" weights
    wch_ref,    # (Hp, Hp)  bf16  concat projection, h-half
    wcc_ref,    # (Hp, Hp)  bf16  concat projection, ctx-half
    bc_ref,     # (1, Hp)   f32
    wo_ref,     # (Hp, Op)  bf16  output projection
    bo_ref,     # (1, Op)   f32   padded classes carry -1e9
    out_ref,    # (B, Op)   f32   per-step softmax probs (time dim squeezed)
    hid_ref,    # (B, Hp)   f32   final hidden (constant block -> written back once)
    h_scr,      # (B, Hp)   f32   VMEM scratch: carried hidden state
):
    t = pl.program_id(0)
    Hp = whh_ref.shape[0]

    @pl.when(t == 0)
    def _init():
        h_scr[...] = h0_ref[...]

    def mm(a, w):
        # bf16 operands on the MXU, f32 accumulation.
        return jnp.dot(a.astype(jnp.bfloat16), w, preferred_element_type=jnp.float32)

    h_prev = h_scr[...]                                   # (B, Hp) f32
    x = x_ref[...]                                        # (B, I)  bf16

    # ---- GRU single step: two fused matmuls, gates r|z|n packed along lanes
    #      (each gate occupies its own 128-aligned Hp block -> zero-cost slices)
    gi = mm(x, wih_ref[...]) + bih_ref[...]               # (B, 3Hp) f32
    gh = mm(h_prev, whh_ref[...]) + bhh_ref[...]          # (B, 3Hp) f32
    r = jax.nn.sigmoid(gi[:, :Hp] + gh[:, :Hp])
    z = jax.nn.sigmoid(gi[:, Hp:2 * Hp] + gh[:, Hp:2 * Hp])
    # gh_n already carries b_hn and must be scaled by r (PyTorch GRU semantics).
    n = jnp.tanh(gi[:, 2 * Hp:] + r * gh[:, 2 * Hp:])
    h_new = (1.0 - z) * n + z * h_prev                    # (B, Hp) f32

    # ---- general attention on the MXU (batched einsum, query length 1) ----
    enc = enc_ref[...]                                    # (B, S, Hp) bf16
    q = mm(h_new, wa_ref[...])                            # (B, Hp) f32
    q3 = q.astype(jnp.bfloat16)[:, None, :]               # (B, 1, Hp)
    scores = jnp.einsum("bqh,bsh->bqs", q3, enc,
                        preferred_element_type=jnp.float32)       # (B, 1, S)
    m = jnp.max(scores, axis=-1, keepdims=True)
    e = jnp.exp(scores - m)
    attn = e * pl.reciprocal(jnp.sum(e, axis=-1, keepdims=True), approx=True)
    ctx = jnp.einsum("bqs,bsh->bqh", attn.astype(jnp.bfloat16), enc,
                     preferred_element_type=jnp.float32)[:, 0, :]  # (B, Hp) f32

    # ---- concat projection without concatenate: two resident matmuls ----
    concat_out = jnp.tanh(mm(h_new, wch_ref[...]) + mm(ctx, wcc_ref[...])
                          + bc_ref[...])                  # (B, Hp) f32

    # ---- output projection + EXACT softmax (padded classes have bias -1e9) ----
    logits = mm(concat_out, wo_ref[...]) + bo_ref[...]    # (B, Op) f32
    lmax = jnp.max(logits, axis=-1, keepdims=True)
    lexp = jnp.exp(logits - lmax)
    probs = lexp / jnp.sum(lexp, axis=-1, keepdims=True)

    out_ref[...] = probs.astype(out_ref.dtype)
    h_scr[...] = h_new
    hid_ref[...] = h_new.astype(hid_ref.dtype)


# -----------------------------------------------------------------------------
# Parameter init (PyTorch-native shapes) and one-time kernel preprocessing.
# -----------------------------------------------------------------------------
def init_params(key, input_size, hidden_size, output_size):
    ks = jax.random.split(key, 9)
    bound = 1.0 / jnp.sqrt(hidden_size)

    def u(k, shape):
        return jax.random.uniform(k, shape, jnp.float32, -bound, bound)

    return {
        "w_ih": u(ks[0], (3 * hidden_size, input_size)),     # GRU weight_ih_l0 (r|z|n)
        "w_hh": u(ks[1], (3 * hidden_size, hidden_size)),    # GRU weight_hh_l0
        "b_ih": u(ks[2], (3 * hidden_size,)),
        "b_hh": u(ks[3], (3 * hidden_size,)),
        "w_attn": u(ks[4], (hidden_size, hidden_size)),      # Attention.weights (no bias)
        "w_concat": u(ks[5], (hidden_size, 2 * hidden_size)),
        "b_concat": u(ks[6], (hidden_size,)),
        "w_out": u(ks[7], (output_size, hidden_size)),
        "b_out": u(ks[8], (output_size,)),
    }


def preprocess_params(params):
    """One-time conversion of PyTorch-layout params into kernel-ready arrays
    (bf16 weights, f32 biases, H/O padded to 128 multiples, gates r|z|n each in
    their own 128-aligned lane block, concat projection split into two halves,
    padded output classes masked with bias -1e9)."""
    H = params["w_hh"].shape[1]
    I = params["w_ih"].shape[1]
    O = params["w_out"].shape[0]
    Hp = _round_up(H, 128)
    Op = _round_up(O, 128)
    NEG = -1e9

    def pack_gate_matT(w, in_dim, in_pad):
        # (3H, in_dim) -> (in_pad, 3Hp), transposed, each gate padded to Hp lanes.
        blocks = []
        for g in range(3):
            gT = w[g * H:(g + 1) * H, :].T                       # (in_dim, H)
            blocks.append(jnp.pad(gT, ((0, in_pad - in_dim), (0, Hp - H))))
        return jnp.concatenate(blocks, axis=1)                   # (in_pad, 3Hp)

    def pack_gate_bias(b):
        return jnp.concatenate(
            [jnp.pad(b[g * H:(g + 1) * H], (0, Hp - H)) for g in range(3)])[None]

    def pad2(w):                                                 # (h, h) -> (Hp, Hp)
        return jnp.pad(w, ((0, Hp - w.shape[0]), (0, Hp - w.shape[1])))

    wc_t = params["w_concat"].T                                  # (2H, H)
    return {
        "wih": pack_gate_matT(params["w_ih"], I, I).astype(jnp.bfloat16),    # (I, 3Hp)
        "whh": pack_gate_matT(params["w_hh"], H, Hp).astype(jnp.bfloat16),   # (Hp, 3Hp)
        "b_ih": pack_gate_bias(params["b_ih"]).astype(jnp.float32),          # (1, 3Hp)
        "b_hh": pack_gate_bias(params["b_hh"]).astype(jnp.float32),          # (1, 3Hp)
        "wa": pad2(params["w_attn"]).astype(jnp.bfloat16),                   # (Hp, Hp)
        "wc_h": pad2(wc_t[:H]).astype(jnp.bfloat16),                         # (Hp, Hp)
        "wc_c": pad2(wc_t[H:]).astype(jnp.bfloat16),                         # (Hp, Hp)
        "b_c": jnp.pad(params["b_concat"], (0, Hp - H))[None].astype(jnp.float32),
        "wo": jnp.pad(params["w_out"].T,
                      ((0, Hp - H), (0, Op - O))).astype(jnp.bfloat16),      # (Hp, Op)
        "b_o": jnp.pad(params["b_out"], (0, Op - O),
                       constant_values=NEG)[None].astype(jnp.float32),       # (1, Op)
    }


# -----------------------------------------------------------------------------
# Wrappers.
# -----------------------------------------------------------------------------
@partial(jax.jit, static_argnames=("output_size",))
def attention_decoder_decode(kparams, inputs, last_hidden, encoder_outputs, *,
                             output_size):
    """Fused multi-step decode (teacher-forced input sequence).

    inputs:          (T, B, I) f32 per-step inputs
    last_hidden:     (1, B, H) f32
    encoder_outputs: (S, B, H) f32 (PyTorch seq-first layout)
    Returns (probs (T, B, O), final hidden (1, B, H)).
    """
    T, B, I = inputs.shape
    S = encoder_outputs.shape[0]
    H = last_hidden.shape[2]
    O = output_size
    Hp = kparams["whh"].shape[0]
    Op = kparams["b_o"].shape[1]

    # Per-decode (NOT per-step) preprocessing: cast to bf16, pad H lanes to Hp,
    # transpose enc once to batch-first so attention runs as batched einsums.
    x = inputs.astype(jnp.bfloat16)                                        # (T, B, I)
    h0 = jnp.pad(last_hidden[0], ((0, 0), (0, Hp - H)))                    # (B, Hp) f32
    enc = jnp.pad(jnp.transpose(encoder_outputs, (1, 0, 2)),
                  ((0, 0), (0, 0), (0, Hp - H))).astype(jnp.bfloat16)      # (B, S, Hp)

    operands = (x, h0, enc,
                kparams["wih"], kparams["whh"], kparams["b_ih"], kparams["b_hh"],
                kparams["wa"], kparams["wc_h"], kparams["wc_c"], kparams["b_c"],
                kparams["wo"], kparams["b_o"])

    resident = lambda t: (0, 0)          # weights / h0 stay in VMEM across steps
    in_specs = [
        pl.BlockSpec((None, B, I), lambda t: (t, 0, 0)),        # x, step t
        pl.BlockSpec((B, Hp), resident),                        # h0
        pl.BlockSpec((B, S, Hp), lambda t: (0, 0, 0)),          # enc, resident
        pl.BlockSpec((I, 3 * Hp), resident),                    # wih
        pl.BlockSpec((Hp, 3 * Hp), resident),                   # whh
        pl.BlockSpec((1, 3 * Hp), resident),                    # b_ih
        pl.BlockSpec((1, 3 * Hp), resident),                    # b_hh
        pl.BlockSpec((Hp, Hp), resident),                       # wa
        pl.BlockSpec((Hp, Hp), resident),                       # wc_h
        pl.BlockSpec((Hp, Hp), resident),                       # wc_c
        pl.BlockSpec((1, Hp), resident),                        # b_c
        pl.BlockSpec((Hp, Op), resident),                       # wo
        pl.BlockSpec((1, Op), resident),                        # b_o
    ]
    out_specs = (
        pl.BlockSpec((None, B, Op), lambda t: (t, 0, 0)),       # per-step probs
        pl.BlockSpec((B, Hp), resident),                        # final hidden
    )
    out_shape = (jax.ShapeDtypeStruct((T, B, Op), jnp.float32),
                 jax.ShapeDtypeStruct((B, Hp), jnp.float32))

    probs_pad, h_last = pl.pallas_call(
        _attention_decoder_kernel,
        grid=(T,),
        in_specs=in_specs,
        out_specs=out_specs,
        out_shape=out_shape,
        scratch_shapes=[pltpu.VMEM((B, Hp), jnp.float32)],      # carried hidden state
        compiler_params=pltpu.CompilerParams(
            dimension_semantics=("arbitrary",)),                # time steps are sequential
    )(*operands)

    # Slice padding off once per decode (outside the kernel, lane-dense inside).
    return probs_pad[:, :, :O], h_last[None, :, :H]


@partial(jax.jit, static_argnames=("output_size",))
def attention_decoder_forward(kparams, input_step, last_hidden, encoder_outputs, *,
                              output_size):
    """Module-equivalent single step: input_step (1,B,I) -> (probs (B,O), hidden (1,B,H))."""
    probs_seq, hidden = attention_decoder_decode(
        kparams, input_step, last_hidden, encoder_outputs, output_size=output_size)
    return probs_seq[0], hidden


# -----------------------------------------------------------------------------
# Pure-JAX reference (mirrors the PyTorch forward in eval mode, f32).
# -----------------------------------------------------------------------------
def reference_forward(params, input_step, last_hidden, encoder_outputs):
    H = params["w_hh"].shape[1]
    x = input_step[0]
    h0 = last_hidden[0]
    gi = x @ params["w_ih"].T + params["b_ih"]
    gh = h0 @ params["w_hh"].T + params["b_hh"]
    r = jax.nn.sigmoid(gi[:, :H] + gh[:, :H])
    z = jax.nn.sigmoid(gi[:, H:2 * H] + gh[:, H:2 * H])
    n = jnp.tanh(gi[:, 2 * H:] + r * gh[:, 2 * H:])
    h_new = (1.0 - z) * n + z * h0                           # (B, H)
    rnn_output = h_new[None]                                 # (1, B, H)

    xp = encoder_outputs @ params["w_attn"].T                # (S, B, H)
    energies = jnp.sum(rnn_output * xp, axis=2)              # (S, B)
    attn = jax.nn.softmax(energies.T, axis=-1)[:, None, :]   # (B, 1, S)
    context = jnp.einsum("bqs,bsh->bqh", attn,
                         jnp.transpose(encoder_outputs, (1, 0, 2)))[:, 0]   # (B, H)

    concat_input = jnp.concatenate([h_new, context], axis=1)
    concat_output = jnp.tanh(concat_input @ params["w_concat"].T + params["b_concat"])
    output = jax.nn.softmax(concat_output @ params["w_out"].T + params["b_out"], axis=1)
    return output, h_new[None]


if __name__ == "__main__":
    B, S, T = 8, 10, 4
    INPUT, HIDDEN, OUTPUT = 16, 32, 24

    key = jax.random.PRNGKey(0)
    kp, k1, k2, k3, k4 = jax.random.split(key, 5)

    params = init_params(kp, INPUT, HIDDEN, OUTPUT)
    kparams = preprocess_params(params)          # one-time, outside the decode path

    input_step = jax.random.normal(k1, (1, B, INPUT), jnp.float32)
    last_hidden = jax.random.normal(k2, (1, B, HIDDEN), jnp.float32)
    encoder_outputs = jax.random.normal(k3, (S, B, HIDDEN), jnp.float32)

    # --- single step (exactly the PyTorch module's forward) ---
    probs, hidden = attention_decoder_forward(kparams, input_step, last_hidden,
                                              encoder_outputs, output_size=OUTPUT)
    jax.block_until_ready((probs, hidden))
    ref_probs, ref_hidden = reference_forward(params, input_step, last_hidden,
                                              encoder_outputs)
    assert probs.shape == (B, OUTPUT) and hidden.shape == (1, B, HIDDEN)
    assert jnp.allclose(jnp.sum(probs, axis=1), 1.0, atol=1e-3)   # exact output softmax
    # bf16 MXU operands (f32 accumulation) -> loosened tolerance vs f32 reference.
    assert jnp.allclose(probs, ref_probs, atol=3e-2)
    assert jnp.allclose(hidden, ref_hidden, atol=2e-2)

    # --- fused multi-step decode: one pallas_call for T steps ---
    inputs_seq = jax.random.normal(k4, (T, B, INPUT), jnp.float32)
    probs_seq, hidden_T = attention_decoder_decode(kparams, inputs_seq, last_hidden,
                                                   encoder_outputs, output_size=OUTPUT)
    jax.block_until_ready((probs_seq, hidden_T))

    h_ref = last_hidden
    ref_seq = []
    for t in range(T):
        p_t, h_ref = reference_forward(params, inputs_seq[t:t + 1], h_ref,
                                       encoder_outputs)
        ref_seq.append(p_t)
    ref_seq = jnp.stack(ref_seq, axis=0)
    assert probs_seq.shape == (T, B, OUTPUT) and hidden_T.shape == (1, B, HIDDEN)
    assert jnp.allclose(probs_seq, ref_seq, atol=5e-2)
    assert jnp.allclose(hidden_T, h_ref, atol=5e-2)

    print("KERNEL_OK")
</pallas_src>

<mosaic_0001>
module attributes {stable_mosaic.version = 11 : i64} {
  func.func @_attention_decoder_kernel(%arg0: i32, %arg1: memref<1x8x16xbf16, #tpu.memory_space<vmem>>, %arg2: memref<8x128xf32, #tpu.memory_space<vmem>>, %arg3: memref<8x10x128xbf16, #tpu.memory_space<vmem>>, %arg4: memref<16x384xbf16, #tpu.memory_space<vmem>>, %arg5: memref<128x384xbf16, #tpu.memory_space<vmem>>, %arg6: memref<1x384xf32, #tpu.memory_space<vmem>>, %arg7: memref<1x384xf32, #tpu.memory_space<vmem>>, %arg8: memref<128x128xbf16, #tpu.memory_space<vmem>>, %arg9: memref<128x128xbf16, #tpu.memory_space<vmem>>, %arg10: memref<128x128xbf16, #tpu.memory_space<vmem>>, %arg11: memref<1x128xf32, #tpu.memory_space<vmem>>, %arg12: memref<128x128xbf16, #tpu.memory_space<vmem>>, %arg13: memref<1x128xf32, #tpu.memory_space<vmem>>, %arg14: memref<1x8x128xf32, #tpu.memory_space<vmem>>, %arg15: memref<8x128xf32, #tpu.memory_space<vmem>>, %arg16: memref<8x128xf32, #tpu.memory_space<vmem>>) attributes {dimension_semantics = [#tpu.dimension_semantics<arbitrary>], iteration_bounds = array<i64: 1>, scalar_prefetch = 0 : i64, scratch_operands = 1 : i64, tpu.core_type = #tpu.core_type<tc>, window_params = [{transform_indices = @transform_0, window_bounds = array<i64: 1, 8, 16>}, {pipeline_mode = #tpu.pipeline_mode<synchronous>, transform_indices = @transform_1, window_bounds = array<i64: 8, 128>}, {pipeline_mode = #tpu.pipeline_mode<synchronous>, transform_indices = @transform_2, window_bounds = array<i64: 8, 10, 128>}, {pipeline_mode = #tpu.pipeline_mode<synchronous>, transform_indices = @transform_3, window_bounds = array<i64: 16, 384>}, {pipeline_mode = #tpu.pipeline_mode<synchronous>, transform_indices = @transform_4, window_bounds = array<i64: 128, 384>}, {pipeline_mode = #tpu.pipeline_mode<synchronous>, transform_indices = @transform_5, window_bounds = array<i64: 1, 384>}, {pipeline_mode = #tpu.pipeline_mode<synchronous>, transform_indices = @transform_6, window_bounds = array<i64: 1, 384>}, {pipeline_mode = #tpu.pipeline_mode<synchronous>, transform_indices = @transform_7, window_bounds = array<i64: 128, 128>}, {pipeline_mode = #tpu.pipeline_mode<synchronous>, transform_indices = @transform_8, window_bounds = array<i64: 128, 128>}, {pipeline_mode = #tpu.pipeline_mode<synchronous>, transform_indices = @transform_9, window_bounds = array<i64: 128, 128>}, {pipeline_mode = #tpu.pipeline_mode<synchronous>, transform_indices = @transform_10, window_bounds = array<i64: 1, 128>}, {pipeline_mode = #tpu.pipeline_mode<synchronous>, transform_indices = @transform_11, window_bounds = array<i64: 128, 128>}, {pipeline_mode = #tpu.pipeline_mode<synchronous>, transform_indices = @transform_12, window_bounds = array<i64: 1, 128>}, {transform_indices = @transform_13, window_bounds = array<i64: 1, 8, 128>}, {pipeline_mode = #tpu.pipeline_mode<synchronous>, transform_indices = @transform_14, window_bounds = array<i64: 8, 128>}]} {
    %c0_i32 = arith.constant 0 : i32
    %0 = arith.cmpi eq, %arg0, %c0_i32 : i32
    %1 = arith.extui %0 : i1 to i32
    %c0_i32_0 = arith.constant 0 : i32
    %2 = arith.cmpi ne, %1, %c0_i32_0 : i32
    scf.if %2 {
      %c0_49 = arith.constant 0 : index
      %c0_50 = arith.constant 0 : index
      %94 = vector.load %arg2[%c0_49, %c0_50] : memref<8x128xf32, #tpu.memory_space<vmem>>, vector<8x128xf32>
      %c0_51 = arith.constant 0 : index
      %c0_52 = arith.constant 0 : index
      %95 = vector.load %arg16[%c0_51, %c0_52] : memref<8x128xf32, #tpu.memory_space<vmem>>, vector<8x128xf32>
      tpu.vector_store %arg16[%c0_51, %c0_52], %94 {strides = array<i32>} : memref<8x128xf32, #tpu.memory_space<vmem>>, vector<8x128xf32>,
    } else {
    }
    %c0 = arith.constant 0 : index
    %c0_1 = arith.constant 0 : index
    %3 = vector.load %arg16[%c0, %c0_1] : memref<8x128xf32, #tpu.memory_space<vmem>>, vector<8x128xf32>
    %c0_2 = arith.constant 0 : index
    %c0_3 = arith.constant 0 : index
    %c0_4 = arith.constant 0 : index
    %4 = vector.load %arg1[%c0_2, %c0_3, %c0_4] : memref<1x8x16xbf16, #tpu.memory_space<vmem>>, vector<1x8x16xbf16>
    %5 = vector.shape_cast %4 : vector<1x8x16xbf16> to vector<8x16xbf16>
    %c0_5 = arith.constant 0 : index
    %c0_6 = arith.constant 0 : index
    %6 = vector.load %arg4[%c0_5, %c0_6] : memref<16x384xbf16, #tpu.memory_space<vmem>>, vector<16x384xbf16>
    %cst = arith.constant dense<0.000000e+00> : vector<8x384xf32>
    %7 = tpu.matmul %5, %6, %cst {dimension_numbers = #tpu.dot_dimension_numbers<[1], [0], [0], [1], [0, 0, 1, 1], [], []>} : vector<8x16xbf16>, vector<16x384xbf16>, vector<8x384xf32> -> vector<8x384xf32>
    %c0_7 = arith.constant 0 : index
    %c0_8 = arith.constant 0 : index
    %8 = vector.load %arg6[%c0_7, %c0_8] : memref<1x384xf32, #tpu.memory_space<vmem>>, vector<1x384xf32>
    %9 = vector.broadcast %8 : vector<1x384xf32> to vector<8x384xf32>
    %10 = arith.addf %7, %9 : vector<8x384xf32>
    %c0_9 = arith.constant 0 : index
    %c0_10 = arith.constant 0 : index
    %11 = vector.load %arg5[%c0_9, %c0_10] : memref<128x384xbf16, #tpu.memory_space<vmem>>, vector<128x384xbf16>
    %12 = arith.truncf %3 : vector<8x128xf32> to vector<8x128xbf16>
    %cst_11 = arith.constant dense<0.000000e+00> : vector<8x384xf32>
    %13 = tpu.matmul %12, %11, %cst_11 {dimension_numbers = #tpu.dot_dimension_numbers<[1], [0], [0], [1], [0, 0, 1, 1], [], []>} : vector<8x128xbf16>, vector<128x384xbf16>, vector<8x384xf32> -> vector<8x384xf32>
    %c0_12 = arith.constant 0 : index
    %c0_13 = arith.constant 0 : index
    %14 = vector.load %arg7[%c0_12, %c0_13] : memref<1x384xf32, #tpu.memory_space<vmem>>, vector<1x384xf32>
    %15 = vector.broadcast %14 : vector<1x384xf32> to vector<8x384xf32>
    %16 = arith.addf %13, %15 : vector<8x384xf32>
    %17 = vector.extract_strided_slice %10 {offsets = [0, 0], sizes = [8, 128], strides = [1, 1]} : vector<8x384xf32> to vector<8x128xf32>
    %18 = vector.extract_strided_slice %16 {offsets = [0, 0], sizes = [8, 128], strides = [1, 1]} : vector<8x384xf32> to vector<8x128xf32>
    %19 = arith.addf %17, %18 : vector<8x128xf32>
    %20 = arith.negf %19 : vector<8x128xf32>
    %21 = math.exp %20 : vector<8x128xf32>
    %cst_14 = arith.constant 1.000000e+00 : f32
    %22 = vector.broadcast %cst_14 : f32 to vector<8x128xf32>
    %23 = arith.addf %22, %21 : vector<8x128xf32>
    %24 = arith.divf %22, %23 : vector<8x128xf32>
    %25 = vector.extract_strided_slice %10 {offsets = [0, 128], sizes = [8, 128], strides = [1, 1]} : vector<8x384xf32> to vector<8x128xf32>
    %26 = vector.extract_strided_slice %16 {offsets = [0, 128], sizes = [8, 128], strides = [1, 1]} : vector<8x384xf32> to vector<8x128xf32>
    %27 = arith.addf %25, %26 : vector<8x128xf32>
    %28 = arith.negf %27 : vector<8x128xf32>
    %29 = math.exp %28 : vector<8x128xf32>
    %cst_15 = arith.constant 1.000000e+00 : f32
    %30 = vector.broadcast %cst_15 : f32 to vector<8x128xf32>
    %31 = arith.addf %30, %29 : vector<8x128xf32>
    %32 = arith.divf %30, %31 : vector<8x128xf32>
    %33 = vector.extract_strided_slice %10 {offsets = [0, 256], sizes = [8, 128], strides = [1, 1]} : vector<8x384xf32> to vector<8x128xf32>
    %34 = vector.extract_strided_slice %16 {offsets = [0, 256], sizes = [8, 128], strides = [1, 1]} : vector<8x384xf32> to vector<8x128xf32>
    %35 = arith.mulf %24, %34 : vector<8x128xf32>
    %36 = arith.addf %33, %35 : vector<8x128xf32>
    %37 = math.tanh %36 : vector<8x128xf32>
    %cst_16 = arith.constant 1.000000e+00 : f32
    %38 = vector.broadcast %cst_16 : f32 to vector<8x128xf32>
    %39 = arith.subf %38, %32 : vector<8x128xf32>
    %40 = arith.mulf %39, %37 : vector<8x128xf32>
    %41 = arith.mulf %32, %3 : vector<8x128xf32>
    %42 = arith.addf %40, %41 : vector<8x128xf32>
    %c0_17 = arith.constant 0 : index
    %c0_18 = arith.constant 0 : index
    %c0_19 = arith.constant 0 : index
    %43 = vector.load %arg3[%c0_17, %c0_18, %c0_19] : memref<8x10x128xbf16, #tpu.memory_space<vmem>>, vector<8x10x128xbf16>
    %c0_20 = arith.constant 0 : index
    %c0_21 = arith.constant 0 : index
    %44 = vector.load %arg8[%c0_20, %c0_21] : memref<128x128xbf16, #tpu.memory_space<vmem>>, vector<128x128xbf16>
    %45 = arith.truncf %42 : vector<8x128xf32> to vector<8x128xbf16>
    %cst_22 = arith.constant dense<0.000000e+00> : vector<8x128xf32>
    %46 = tpu.matmul %45, %44, %cst_22 {dimension_numbers = #tpu.dot_dimension_numbers<[1], [0], [0], [1], [0, 0, 1, 1], [], []>} : vector<8x128xbf16>, vector<128x128xbf16>, vector<8x128xf32> -> vector<8x128xf32>
    %47 = arith.truncf %46 : vector<8x128xf32> to vector<8x128xbf16>
    %48 = vector.shape_cast %47 : vector<8x128xbf16> to vector<8x1x128xbf16>
    "tpu.trace_start"() <{level = 10 : i32, message = "bqh,bsh->bqs"}> : () -> ()
    %cst_23 = arith.constant dense<0.000000e+00> : vector<8x1x10xf32>
    %49 = tpu.matmul %48, %43, %cst_23 {dimension_numbers = #tpu.dot_dimension_numbers<[2], [2], [1], [1], [0, 0, 0, 1, 1, 1], [0], [0]>} : vector<8x1x128xbf16>, vector<8x10x128xbf16>, vector<8x1x10xf32> -> vector<8x1x10xf32>
    "tpu.trace_stop"() : () -> ()
    %cst_24 = arith.constant dense<0xFF800000> : vector<8x1xf32>
    %50 = vector.multi_reduction <maximumf>, %49, %cst_24 [2] : vector<8x1x10xf32> to vector<8x1xf32>
    %51 = vector.shape_cast %50 : vector<8x1xf32> to vector<8x1x1xf32>
    %52 = vector.broadcast %51 : vector<8x1x1xf32> to vector<8x1x10xf32>
    %53 = arith.subf %49, %52 : vector<8x1x10xf32>
    %54 = math.exp %53 : vector<8x1x10xf32>
    %cst_25 = arith.constant dense<0.000000e+00> : vector<8x1xf32>
    %55 = vector.multi_reduction <add>, %54, %cst_25 [2] : vector<8x1x10xf32> to vector<8x1xf32>
    %56 = vector.shape_cast %55 : vector<8x1xf32> to vector<8x1x1xf32>
    %57 = tpu.reciprocal %56 {approx = true} : vector<8x1x1xf32> -> vector<8x1x1xf32>
    %58 = vector.broadcast %57 : vector<8x1x1xf32> to vector<8x1x10xf32>
    %59 = arith.mulf %54, %58 : vector<8x1x10xf32>
    %60 = arith.truncf %59 : vector<8x1x10xf32> to vector<8x1x10xbf16>
    "tpu.trace_start"() <{level = 10 : i32, message = "bqs,bsh->bqh"}> : () -> ()
    %cst_26 = arith.constant dense<0.000000e+00> : vector<8x1x128xf32>
    %61 = tpu.matmul %60, %43, %cst_26 {dimension_numbers = #tpu.dot_dimension_numbers<[2], [1], [1], [2], [0, 0, 0, 1, 1, 2], [0], [0]>} : vector<8x1x10xbf16>, vector<8x10x128xbf16>, vector<8x1x128xf32> -> vector<8x1x128xf32>
    "tpu.trace_stop"() : () -> ()
    %62 = vector.shape_cast %61 : vector<8x1x128xf32> to vector<8x128xf32>
    %c0_27 = arith.constant 0 : index
    %c0_28 = arith.constant 0 : index
    %63 = vector.load %arg9[%c0_27, %c0_28] : memref<128x128xbf16, #tpu.memory_space<vmem>>, vector<128x128xbf16>
    %64 = arith.truncf %42 : vector<8x128xf32> to vector<8x128xbf16>
    %cst_29 = arith.constant dense<0.000000e+00> : vector<8x128xf32>
    %65 = tpu.matmul %64, %63, %cst_29 {dimension_numbers = #tpu.dot_dimension_numbers<[1], [0], [0], [1], [0, 0, 1, 1], [], []>} : vector<8x128xbf16>, vector<128x128xbf16>, vector<8x128xf32> -> vector<8x128xf32>
    %c0_30 = arith.constant 0 : index
    %c0_31 = arith.constant 0 : index
    %66 = vector.load %arg10[%c0_30, %c0_31] : memref<128x128xbf16, #tpu.memory_space<vmem>>, vector<128x128xbf16>
    %67 = arith.truncf %62 : vector<8x128xf32> to vector<8x128xbf16>
    %cst_32 = arith.constant dense<0.000000e+00> : vector<8x128xf32>
    %68 = tpu.matmul %67, %66, %cst_32 {dimension_numbers = #tpu.dot_dimension_numbers<[1], [0], [0], [1], [0, 0, 1, 1], [], []>} : vector<8x128xbf16>, vector<128x128xbf16>, vector<8x128xf32> -> vector<8x128xf32>
    %69 = arith.addf %65, %68 : vector<8x128xf32>
    %c0_33 = arith.constant 0 : index
    %c0_34 = arith.constant 0 : index
    %70 = vector.load %arg11[%c0_33, %c0_34] : memref<1x128xf32, #tpu.memory_space<vmem>>, vector<1x128xf32>
    %71 = vector.broadcast %70 : vector<1x128xf32> to vector<8x128xf32>
    %72 = arith.addf %69, %71 : vector<8x128xf32>
    %73 = math.tanh %72 : vector<8x128xf32>
    %c0_35 = arith.constant 0 : index
    %c0_36 = arith.constant 0 : index
    %74 = vector.load %arg12[%c0_35, %c0_36] : memref<128x128xbf16, #tpu.memory_space<vmem>>, vector<128x128xbf16>
    %75 = arith.truncf %73 : vector<8x128xf32> to vector<8x128xbf16>
    %cst_37 = arith.constant dense<0.000000e+00> : vector<8x128xf32>
    %76 = tpu.matmul %75, %74, %cst_37 {dimension_numbers = #tpu.dot_dimension_numbers<[1], [0], [0], [1], [0, 0, 1, 1], [], []>} : vector<8x128xbf16>, vector<128x128xbf16>, vector<8x128xf32> -> vector<8x128xf32>
    %c0_38 = arith.constant 0 : index
    %c0_39 = arith.constant 0 : index
    %77 = vector.load %arg13[%c0_38, %c0_39] : memref<1x128xf32, #tpu.memory_space<vmem>>, vector<1x128xf32>
    %78 = vector.broadcast %77 : vector<1x128xf32> to vector<8x128xf32>
    %79 = arith.addf %76, %78 : vector<8x128xf32>
    %cst_40 = arith.constant dense<0xFF800000> : vector<8xf32>
    %80 = vector.multi_reduction <maximumf>, %79, %cst_40 [1] : vector<8x128xf32> to vector<8xf32>
    %81 = vector.shape_cast %80 : vector<8xf32> to vector<8x1xf32>
    %82 = vector.broadcast %81 : vector<8x1xf32> to vector<8x128xf32>
    %83 = arith.subf %79, %82 : vector<8x128xf32>
    %84 = math.exp %83 : vector<8x128xf32>
    %cst_41 = arith.constant dense<0.000000e+00> : vector<8xf32>
    %85 = vector.multi_reduction <add>, %84, %cst_41 [1] : vector<8x128xf32> to vector<8xf32>
    %86 = vector.shape_cast %85 : vector<8xf32> to vector<8x1xf32>
    %87 = vector.broadcast %86 : vector<8x1xf32> to vector<8x128xf32>
    %88 = arith.divf %84, %87 : vector<8x128xf32>
    %c0_42 = arith.constant 0 : index
    %c0_43 = arith.constant 0 : index
    %c0_44 = arith.constant 0 : index
    %89 = vector.load %arg14[%c0_42, %c0_43, %c0_44] : memref<1x8x128xf32, #tpu.memory_space<vmem>>, vector<1x8x128xf32>
    %90 = vector.shape_cast %89 : vector<1x8x128xf32> to vector<8x128xf32>
    %91 = vector.shape_cast %88 : vector<8x128xf32> to vector<1x8x128xf32>
    tpu.vector_store %arg14[%c0_42, %c0_43, %c0_44], %91 {strides = array<i32>} : memref<1x8x128xf32, #tpu.memory_space<vmem>>, vector<1x8x128xf32>,
    %c0_45 = arith.constant 0 : index
    %c0_46 = arith.constant 0 : index
    %92 = vector.load %arg16[%c0_45, %c0_46] : memref<8x128xf32, #tpu.memory_space<vmem>>, vector<8x128xf32>
    tpu.vector_store %arg16[%c0_45, %c0_46], %42 {strides = array<i32>} : memref<8x128xf32, #tpu.memory_space<vmem>>, vector<8x128xf32>,
    %c0_47 = arith.constant 0 : index
    %c0_48 = arith.constant 0 : index
    %93 = vector.load %arg15[%c0_47, %c0_48] : memref<8x128xf32, #tpu.memory_space<vmem>>, vector<8x128xf32>
    tpu.vector_store %arg15[%c0_47, %c0_48], %42 {strides = array<i32>} : memref<8x128xf32, #tpu.memory_space<vmem>>, vector<8x128xf32>,
    return
  }
  func.func @transform_0(%arg0: i32) -> (i32, i32, i32) {
    %c0_i32 = arith.constant 0 : i32
    %c0_i32_0 = arith.constant 0 : i32
    %c0_i32_1 = arith.constant 0 : i32
    return %arg0, %c0_i32, %c0_i32_0 : i32, i32, i32
  }
  func.func @transform_1(%arg0: i32) -> (i32, i32) {
    %c0_i32 = arith.constant 0 : i32
    %c0_i32_0 = arith.constant 0 : i32
    %c0_i32_1 = arith.constant 0 : i32
    return %c0_i32, %c0_i32_0 : i32, i32
  }
  func.func @transform_2(%arg0: i32) -> (i32, i32, i32) {
    %c0_i32 = arith.constant 0 : i32
    %c0_i32_0 = arith.constant 0 : i32
    %c0_i32_1 = arith.constant 0 : i32
    %c0_i32_2 = arith.constant 0 : i32
    return %c0_i32, %c0_i32_0, %c0_i32_1 : i32, i32, i32
  }
  func.func @transform_3(%arg0: i32) -> (i32, i32) {
    %c0_i32 = arith.constant 0 : i32
    %c0_i32_0 = arith.constant 0 : i32
    %c0_i32_1 = arith.constant 0 : i32
    return %c0_i32, %c0_i32_0 : i32, i32
  }
  func.func @transform_4(%arg0: i32) -> (i32, i32) {
    %c0_i32 = arith.constant 0 : i32
    %c0_i32_0 = arith.constant 0 : i32
    %c0_i32_1 = arith.constant 0 : i32
    return %c0_i32, %c0_i32_0 : i32, i32
  }
  func.func @transform_5(%arg0: i32) -> (i32, i32) {
    %c0_i32 = arith.constant 0 : i32
    %c0_i32_0 = arith.constant 0 : i32
    %c0_i32_1 = arith.constant 0 : i32
    return %c0_i32, %c0_i32_0 : i32, i32
  }
  func.func @transform_6(%arg0: i32) -> (i32, i32) {
    %c0_i32 = arith.constant 0 : i32
    %c0_i32_0 = arith.constant 0 : i32
    %c0_i32_1 = arith.constant 0 : i32
    return %c0_i32, %c0_i32_0 : i32, i32
  }
  func.func @transform_7(%arg0: i32) -> (i32, i32) {
    %c0_i32 = arith.constant 0 : i32
    %c0_i32_0 = arith.constant 0 : i32
    %c0_i32_1 = arith.constant 0 : i32
    return %c0_i32, %c0_i32_0 : i32, i32
  }
  func.func @transform_8(%arg0: i32) -> (i32, i32) {
    %c0_i32 = arith.constant 0 : i32
    %c0_i32_0 = arith.constant 0 : i32
    %c0_i32_1 = arith.constant 0 : i32
    return %c0_i32, %c0_i32_0 : i32, i32
  }
  func.func @transform_9(%arg0: i32) -> (i32, i32) {
    %c0_i32 = arith.constant 0 : i32
    %c0_i32_0 = arith.constant 0 : i32
    %c0_i32_1 = arith.constant 0 : i32
    return %c0_i32, %c0_i32_0 : i32, i32
  }
  func.func @transform_10(%arg0: i32) -> (i32, i32) {
    %c0_i32 = arith.constant 0 : i32
    %c0_i32_0 = arith.constant 0 : i32
    %c0_i32_1 = arith.constant 0 : i32
    return %c0_i32, %c0_i32_0 : i32, i32
  }
  func.func @transform_11(%arg0: i32) -> (i32, i32) {
    %c0_i32 = arith.constant 0 : i32
    %c0_i32_0 = arith.constant 0 : i32
    %c0_i32_1 = arith.constant 0 : i32
    return %c0_i32, %c0_i32_0 : i32, i32
  }
  func.func @transform_12(%arg0: i32) -> (i32, i32) {
    %c0_i32 = arith.constant 0 : i32
    %c0_i32_0 = arith.constant 0 : i32
    %c0_i32_1 = arith.constant 0 : i32
    return %c0_i32, %c0_i32_0 : i32, i32
  }
  func.func @transform_13(%arg0: i32) -> (i32, i32, i32) {
    %c0_i32 = arith.constant 0 : i32
    %c0_i32_0 = arith.constant 0 : i32
    %c0_i32_1 = arith.constant 0 : i32
    return %arg0, %c0_i32, %c0_i32_0 : i32, i32, i32
  }
  func.func @transform_14(%arg0: i32) -> (i32, i32) {
    %c0_i32 = arith.constant 0 : i32
    %c0_i32_0 = arith.constant 0 : i32
    %c0_i32_1 = arith.constant 0 : i32
    return %c0_i32, %c0_i32_0 : i32, i32
  }
}

</mosaic_0001>

<bundles_post_ra>
// kernel: attention_decoder_decode.1
= control target key start
LH: loop header
LB: loop body
LE: loop exit
PB: predicated region body
PF: predicated region fallthrough
CT: control target
= control target key end

     0   :  { %20 = vsyncpa [#allocation4], 0  ;;  %s3040_s0 = inlined_call_operand.vmem [shape: bf16[1,8,16], index: 0, kind: input, shape index: {}]   ;;  %s3041_s1 = inlined_call_operand.vmem [shape: f32[8,128], index: 1, kind: input, shape index: {}]   ;;  %s3042_s2 = inlined_call_operand.vmem [shape: bf16[8,10,128], index: 2, kind: input, shape index: {}]   ;;  %s3043_s3 = inlined_call_operand.hbm [shape: bf16[16,384], index: 3, kind: input, shape index: {}]   ;;  %s3044_s4 = inlined_call_operand.vmem [shape: bf16[128,384], index: 4, kind: input, shape index: {}]   ;;  %s3045_s5 = inlined_call_operand.vmem [shape: f32[1,384], index: 5, kind: input, shape index: {}]   ;;  %s3046_s6 = inlined_call_operand.vmem [shape: f32[1,384], index: 6, kind: input, shape index: {}]   ;;  %s3047_s7 = inlined_call_operand.vmem [shape: bf16[128,128], index: 7, kind: input, shape index: {}]   ;;  %s3048_s8 = inlined_call_operand.vmem [shape: bf16[128,128], index: 8, kind: input, shape index: {}]   ;;  %s3049_s9 = inlined_call_operand.vmem [shape: bf16[128,128], index: 9, kind: input, shape index: {}]   ;;  %s3050_s10 = inlined_call_operand.vmem [shape: f32[1,128], index: 10, kind: input, shape index: {}]   ;;  %s3051_s11 = inlined_call_operand.hbm [shape: bf16[128,128], index: 11, kind: input, shape index: {}]   ;;  %s3052_s12 = inlined_call_operand.vmem [shape: f32[1,128], index: 12, kind: input, shape index: {}]   ;;  %s3053_s13 = inlined_call_operand.hbm [shape: f32[1,8,128], index: 13, kind: output, shape index: {0}]   ;;  %s3054_s14 = inlined_call_operand.vmem [shape: f32[8,128], index: 14, kind: output, shape index: {1}]  }
   0x1   :  { %21 = vsyncpa [#allocation7], 0 }
   0x2   :  { %22 = vsyncpa [#allocation5], 0  ;;  %s2513_s29 = smov [#allocation3]   ;;  %s2441_s17 = scalar_lea.hbm %s3043_s3, 384 }
   0x3   :  { %s34_s30 = sshll.u32 %s2513_s29, 4  ;;  %p2442_p0 = scmp.ne.s32.totalorder %s3043_s3, %s2441_s17  ;;  %s35_s30 = int_to_ptr.vmem [resolvable:$true] %s34_s30 }
   0x4   :  { %p2445_p1 = scmp.lt.u32.totalorder %s2441_s17, %s3043_s3 }
   0x6   :  { %p2447_p2 = pnand %p2445_p1, %p2442_p0 }
   0x8   :  { %2450 = shalt.err (!%p2447_p2)
}
   0x9   :  { %s2451_s22 = scalar_lea.vmem %s35_s30, 384  ;;  %p2456_p4 = scmp.lt.s32.totalorder %s35_s30, %s35_s30 }
   0xa   :  { %p2452_p3 = scmp.ne.s32.totalorder %s35_s30, %s2451_s22  ;;  %p2457_p5 = scmp.lt.s32.totalorder %s2451_s22, %s2451_s22 }
   0xc   :  { %p2458_p6 = por %p2457_p5, %p2456_p4 }
   0xe   :  { %p2459_p7 = pnand %p2458_p6, %p2452_p3 }
  0x10   :  { %2462 = shalt.err (!%p2459_p7)
}
  0x11   :  { %s2514_s23 = smov 192   ;;  %s2515_s24 = smov 12  }
  0x12   :  { %40 = dma.hbm_to_vmem [thread:$0]  %s3043_s3, 384, %s35_s30, [#allocation4], %s2514_s23, %s2514_s23, %s2515_s24  }
  0x13   :  { %s2516_s27 = smov [#allocation6]   ;;  %s2463_s16 = scalar_lea.hbm %s3051_s11, 1024 }
  0x14   :  { %s60_s28 = sshll.u32 %s2516_s27, 4  ;;  %p2464_p8 = scmp.ne.s32.totalorder %s3051_s11, %s2463_s16  ;;  %s61_s28 = int_to_ptr.vmem [resolvable:$true] %s60_s28 }
  0x15   :  { %p2467_p9 = scmp.lt.u32.totalorder %s2463_s16, %s3051_s11 }
  0x17   :  { %p2469_p10 = pnand %p2467_p9, %p2464_p8 }
  0x19   :  { %2472 = shalt.err (!%p2469_p10)
}
  0x1a   :  { %s2473_s21 = scalar_lea.vmem %s61_s28, 1024  ;;  %p2478_p12 = scmp.lt.s32.totalorder %s61_s28, %s61_s28 }
  0x1b   :  { %p2474_p11 = scmp.ne.s32.totalorder %s61_s28, %s2473_s21  ;;  %p2479_p13 = scmp.lt.s32.totalorder %s2473_s21, %s2473_s21 }
  0x1d   :  { %p2480_p0 = por %p2479_p13, %p2478_p12 }
  0x1f   :  { %p2481_p1 = pnand %p2480_p0, %p2474_p11 }
  0x21   :  { %2484 = shalt.err (!%p2481_p1)
}
  0x22   :  { %s2517_s3 = smov 64   ;;  %s2518_s30 = smov 4  }
  0x23   :  { %66 = dma.hbm_to_vmem [thread:$0]  %s3051_s11, 1024, %s61_s28, [#allocation7], %s2517_s3, %s2517_s3, %s2518_s30  }
  0x24   :  { %2507 = dma.done.wait [#allocation4], 384  }
  0x25   :  { %2508 = vsyncadd [#allocation4], 4294966912 }
  0x26   :  { %2509 = dma.done.wait [#allocation7], 1024  }
  0x27   :  { %2510 = vsyncadd [#allocation7], 4294966272  ;;  %v2519_v0 = vmov 0   ;;  %v2520_v1 = vmov 0.0   ;;  %vm2521_vm0 = vmmov 0   ;;  %vm121_vm1 = vcmask 130048  }
  0x28   :  { %157 = vmatprep.mubr.bf16.mxu0 %v2519_v0  ;;  %2096 = vmatprep.subr.bf16.mxu1 %v2520_v1  ;;  %v2317_v2 = vld [vmem:[#allocation3 + $0x4] ss:$12 sps:$4 sm:$0xff]   ;;  %v2319_v3 = vld [vmem:[#allocation3] ss:$12 sps:$4 sm:$0xff]   ;;  %v2325_v7 = vld [vmem:[%s3044_s4 + $0x1c] ss:$12 sps:$4 sm:$0xff]   ;;  %v90_v44 = vlaneseq }
  0x29   :  { %2098 = vmatprep.mubr.msk.bf16.mxu1 %vm2521_vm0, %v2520_v1  ;;  %125 = vmatprep.subr.bf16.mxu0 %v2317_v2  ;;  %v2320_v4 = vld [vmem:[%s3044_s4] ss:$12 sps:$4 sm:$0xff]   ;;  %v2322_v5 = vld [vmem:[%s3044_s4 + $0x4] ss:$12 sps:$4 sm:$0xff]   ;;  %v2335_v10 = vld [vmem:[#allocation3 + $0x8] ss:$12 sps:$4 sm:$0xff]  }
  0x2a   :  { %126 = vmatpush1.bf16.msra.mxu0 %v2319_v3  ;;  %v83_v6 = vld [vmem:[%s3040_s0] sm:$0xf]  ;;  %v2323_v8 = vld [vmem:[%s3044_s4 + $0x18] ss:$12 sps:$4 sm:$0xff]   ;;  %v2326_v11 = vld [vmem:[%s3044_s4 + $0x30] ss:$12 sps:$4 sm:$0xff]   ;;  %2097 = vmatpush3.bf16.msra.mxu1 %v2335_v10 }
  0x2b   :  { %384 = vmatprep.subr.bf16.mxu0 %v2322_v5  ;;  %v2328_v9 = vld [vmem:[%s3044_s4 + $0x34] ss:$12 sps:$4 sm:$0xff]   ;;  %v2331_v12 = vld [vmem:[%s3044_s4 + $0x4c] ss:$12 sps:$4 sm:$0xff]   ;;  %2102 = vmatprep.subr.bf16.mxu1 %v2520_v1  ;;  %v2334_v16 = vld [vmem:[%s3044_s4 + $0x64] ss:$12 sps:$4 sm:$0xff]  }
  0x2c   :  { %v2342_v13 = vld [vmem:[%s3044_s4 + $0x8] ss:$12 sps:$4 sm:$0xff]   ;;  %v2346_v15 = vld [vmem:[%s3044_s4 + $0x20] ss:$12 sps:$4 sm:$0xff]   ;;  %v2347_v18 = vld [vmem:[%s3044_s4 + $0x38] ss:$12 sps:$4 sm:$0xff]  }
  0x2d   :  { %1935 = vmatmul.mubr.msk.bf16.vlgmr.msra.gmra.mrb[0].mxu0 %vm121_vm1, %v83_v6  ;;  %2099 = vmatmul.mubr.msk.bf16.vlgmr.msra.gmra.mrb[0].mxu1 %vm121_vm1, %v83_v6  ;;  %v2329_v14 = vld [vmem:[%s3044_s4 + $0x48] ss:$12 sps:$4 sm:$0xff]   ;;  %v2332_v17 = vld [vmem:[%s3044_s4 + $0x60] ss:$12 sps:$4 sm:$0xff]   ;;  %v2336_v20 = vld [vmem:[%s3044_s4 + $0x78] ss:$12 sps:$4 sm:$0xff]  }
  0x2e   :  { %385 = vmatpush1.bf16.msra.mxu0 %v2320_v4  ;;  %416 = vmatprep.mubr.bf16.mxu0 %v2519_v0  ;;  %v2338_v19 = vld [vmem:[%s3044_s4 + $0x7c] ss:$12 sps:$4 sm:$0xff]   ;;  %v2341_v22 = vld [vmem:[%s3044_s4 + $0x94] ss:$12 sps:$4 sm:$0xff]   ;;  %v2345_v25 = vld [vmem:[%s3044_s4 + $0xac] ss:$12 sps:$4 sm:$0xff]  }
  0x2f   :  { %386 = vmatprep.subr.bf16.mxu0 %v2325_v7  ;;  %2103 = vmatpush3.bf16.msra.mxu1 %v2342_v13  ;;  %v2348_v21 = vld [vmem:[%s3044_s4 + $0x50] ss:$12 sps:$4 sm:$0xff]   ;;  %v2349_v24 = vld [vmem:[%s3044_s4 + $0x68] ss:$12 sps:$4 sm:$0xff]   ;;  %v2704_v27 = vld [vmem:[%s3041_s1] sm:$0xff]  ;;  %v91_v45 = vshrl.u32 %v90_v44, 7 }
  0x30   :  { %2104 = vmatprep.subr.bf16.mxu1 %v2520_v1  ;;  %2118 = vmatprep.mubr.msk.bf16.mxu1 %vm2521_vm0, %v2520_v1  ;;  %v2339_v23 = vld [vmem:[%s3044_s4 + $0x90] ss:$12 sps:$4 sm:$0xff]   ;;  %v2343_v26 = vld [vmem:[%s3044_s4 + $0xa8] ss:$12 sps:$4 sm:$0xff]   ;;  %v2350_v28 = vld [vmem:[%s3044_s4 + $0x80] ss:$12 sps:$4 sm:$0xff]   ;;  %v238_v30 = vpack.c.bf16 %v2704_v27, %v2704_v27 }
  0x31   :  { %v2351_v29 = vld [vmem:[%s3044_s4 + $0x98] ss:$12 sps:$4 sm:$0xff]   ;;  %v2352_v31 = vld [vmem:[%s3044_s4 + $0xb0] ss:$12 sps:$4 sm:$0xff]   ;;  %v2354_v33 = vld [vmem:[%s3047_s7 + $0x8] sm:$0xff]   ;;  %v2758_v46 = vsub.s32 0, %v91_v45 }
  0x32   :  { %387 = vmatpush1.bf16.msra.mxu0 %v2323_v8  ;;  %v2353_v32 = vld [vmem:[%s3047_s7] sm:$0xff]   ;;  %v2355_v34 = vld [vmem:[%s3047_s7 + $0x10] sm:$0xff]   ;;  %v2356_v35 = vld [vmem:[%s3047_s7 + $0x18] sm:$0xff]   ;;  %v96_v49 = vsub.s32 1, %v91_v45  ;;  %v100_v7 = vsub.s32 2, %v91_v45  ;;  %vm1057_vm2 = vcmask 73728  }
  0x33   :  { %388 = vmatprep.subr.bf16.mxu0 %v2328_v9  ;;  %2105 = vmatpush3.bf16.msra.mxu1 %v2346_v15  ;;  %v2357_v36 = vld [vmem:[%s3047_s7 + $0x20] sm:$0xff]   ;;  %v2358_v37 = vld [vmem:[%s3047_s7 + $0x28] sm:$0xff]   ;;  %v2359_v38 = vld [vmem:[%s3047_s7 + $0x30] sm:$0xff]   ;;  %vm1158_vm3 = vcmask 1044480   ;;  %vm1154_vm4 = vcmask 80896   ;;  %vm1581_vm5 = vcmask 1041409  }
  0x34   :  { %2106 = vmatprep.subr.bf16.mxu1 %v2520_v1  ;;  %v2360_v39 = vld [vmem:[%s3047_s7 + $0x38] sm:$0xff]   ;;  %v239_v47 = vld [vmem:[%s3046_s6] sm:$0x7]  ;;  %vm1584_vm6 = vcmask 1042434   ;;  %vm1587_vm7 = vcmask 1043459   ;;  %vm1590_vm8 = vcmask 1044484  }
  0x35   :  { %v88_v48 = vld [vmem:[%s3045_s5] sm:$0x7]  ;;  %v244_v51 = vrot.slane %v239_v47, %v2758_v46  ;;  %v248_v53 = vrot.slane %v239_v47, %v96_v49  ;;  %v252_v8 = vrot.slane %v239_v47, %v100_v7  ;;  %v2807_v47 = vld [vmem:[%s3042_s2 + $0x18] sm:$0x1f]   ;;  %vm1593_vm9 = vcmask 1045509  }
  0x36   :  { %389 = vmatpush1.bf16.msra.mxu0 %v2326_v11  ;;  %v93_v50 = vrot.slane %v88_v48, %v2758_v46  ;;  %v97_v52 = vrot.slane %v88_v48, %v96_v49  ;;  %v101_v10 = vrot.slane %v88_v48, %v100_v7  ;;  %vm1596_vm10 = vcmask 1046534  }
  0x37   :  { %390 = vmatprep.subr.bf16.mxu0 %v2331_v12  ;;  %2107 = vmatpush3.bf16.msra.mxu1 %v2347_v18  ;;  %vm1599_vm11 = vcmask 1047559  }
  0x38   :  { %2108 = vmatprep.subr.bf16.mxu1 %v2520_v1  ;;  %v2298_v54 = vadd.f32 %v244_v51, %v93_v50  ;;  %v2300_v56 = vadd.f32 %v248_v53, %v97_v52  ;;  %v2817_v51 = vld [vmem:[%s3042_s2 + $0x20] sm:$0x1f]  }
  0x3a   :  { %391 = vmatpush1.bf16.msra.mxu0 %v2329_v14 }
  0x3b   :  { %392 = vmatprep.subr.bf16.mxu0 %v2334_v16  ;;  %2109 = vmatpush3.bf16.msra.mxu1 %v2348_v21 }
  0x3c   :  { %2110 = vmatprep.subr.bf16.mxu1 %v2520_v1 }
  0x3e   :  { %393 = vmatpush1.bf16.msra.mxu0 %v2332_v17 }
  0x3f   :  { %394 = vmatprep.subr.bf16.mxu0 %v2338_v19  ;;  %2111 = vmatpush3.bf16.msra.mxu1 %v2349_v24  ;;  %v2780_v24 = vld [vmem:[%s3042_s2] sm:$0x1f]  }
  0x40   :  { %2112 = vmatprep.subr.bf16.mxu1 %v2520_v1 }
  0x42   :  { %395 = vmatpush1.bf16.msra.mxu0 %v2336_v20 }
  0x43   :  { %396 = vmatprep.subr.bf16.mxu0 %v2341_v22  ;;  %2113 = vmatpush3.bf16.msra.mxu1 %v2350_v28 }
  0x44   :  { %2114 = vmatprep.subr.bf16.mxu1 %v2520_v1 }
  0x46   :  { %397 = vmatpush1.bf16.msra.mxu0 %v2339_v23 }
  0x47   :  { %398 = vmatprep.subr.bf16.mxu0 %v2345_v25  ;;  %2115 = vmatpush3.bf16.msra.mxu1 %v2351_v29  ;;  %v2522_v25 = vmov 1966171168  }
  0x48   :  { %2116 = vmatprep.subr.bf16.mxu1 %v2520_v1 }
  0x4a   :  { %399 = vmatpush1.bf16.msra.mxu0 %v2343_v26  ;;  %v610_v26 = vunpack.c.l.s4 %v2522_v25 }
  0x4b   :  { %2122 = vmatprep.subr.bf16.mxu0 %v2520_v1  ;;  %2117 = vmatpush3.bf16.msra.mxu1 %v2352_v31 }
  0x4c   :  { %2142 = vmatprep.subr.bf16.mxu1 %v2520_v1 }
  0x4d   :  { %417 = vmatmul.mubr.bf16.vlgmr.msra.gmra.mrb[0].mxu0 %v238_v30 }
  0x4e   :  { %2138 = vmatprep.mubr.msk.bf16.mxu0 %vm2521_vm0, %v2520_v1  ;;  %2119 = vmatmul.mubr.bf16.vlgmr.msra.gmra.mrb[4].mxu1 %v238_v30 }
  0x4f   :  { %2144 = vmatprep.mubr.msk.bf16.mxu1 %vm2521_vm0, %v2520_v1  ;;  %2123 = vmatpush3.bf16.msra.mxu0 %v2353_v32 }
  0x50   :  { %2124 = vmatprep.subr.bf16.mxu0 %v2520_v1 }
  0x53   :  { %2125 = vmatpush3.bf16.msra.mxu0 %v2354_v33 }
  0x54   :  { %2126 = vmatprep.subr.bf16.mxu0 %v2520_v1  ;;  %2143 = vmatpush3.bf16.xpose.msra.mxu1 %v2780_v24 }
  0x55   :  { %2148 = vmatprep.subr.bf16.mxu1 %v2520_v1 }
  0x57   :  { %2127 = vmatpush3.bf16.msra.mxu0 %v2355_v34 }
  0x58   :  { %2128 = vmatprep.subr.bf16.mxu0 %v2520_v1 }
  0x5b   :  { %2129 = vmatpush3.bf16.msra.mxu0 %v2356_v35 }
  0x5c   :  { %2130 = vmatprep.subr.bf16.mxu0 %v2520_v1 }
  0x5f   :  { %2131 = vmatpush3.bf16.msra.mxu0 %v2357_v36 }
  0x60   :  { %2132 = vmatprep.subr.bf16.mxu0 %v2520_v1 }
  0x63   :  { %2133 = vmatpush3.bf16.msra.mxu0 %v2358_v37  ;;  %v2787_v37 = vld [vmem:[%s3042_s2 + $0x8] sm:$0x1f]  }
  0x64   :  { %2134 = vmatprep.subr.bf16.mxu0 %v2520_v1 }
  0x67   :  { %2135 = vmatpush3.bf16.msra.mxu0 %v2359_v38 }
  0x68   :  { %2136 = vmatprep.subr.bf16.mxu0 %v2520_v1 }
  0x6b   :  { %2137 = vmatpush3.bf16.msra.mxu0 %v2360_v39 }
  0x6c   :  { %2190 = vmatprep.subr.bf16.mxu0 %v2520_v1 }
 0x100   :  { %v200_v40 = vpop.f32.mrb[0].mxu1 }
 0x101   :  { %v2100_v41 = vpop.f32.mrb[1].mxu1  ;;  %v201_v14 = vadd.f32 %v200_v40, %v101_v10 }
 0x102   :  { %v203_v42 = vpop.f32.mrb[2].mxu1 }
 0x103   :  { %v2101_v43 = vpop.f32.mrb[3].mxu1  ;;  %v2797_v42 = vld [vmem:[%s3042_s2 + $0x10] sm:$0x1f]  }
 0x120   :  { %v418_v55 = vpop.f32.mrb[0].mxu0 }
 0x121   :  { %v2299_v57 = vadd.f32 %v2298_v54, %v418_v55  ;;  %v420_v58 = vpop.f32.mrb[1].mxu0  ;;  %v459_v0 = vpop.f32.mrb[4].mxu1  ;;  %v2827_v55 = vld [vmem:[%s3042_s2 + $0x28] sm:$0x1f]  }
 0x122   :  { %v422_v59 = vpop.f32.mrb[2].mxu0  ;;  %v2301_v62 = vadd.f32 %v2300_v56, %v420_v58  ;;  %v2120_v2 = vpop.f32.mrb[5].mxu1  ;;  %v460_v12 = vadd.f32 %v459_v0, %v252_v8 }
 0x123   :  { %v1961_v60 = vmul.f32 -1.442695, %v2299_v57  ;;  %v423_v61 = vpop.f32.mrb[3].mxu0  ;;  %v462_v3 = vpop.f32.mrb[6].mxu1  ;;  %v2837_v59 = vld [vmem:[%s3042_s2 + $0x30] sm:$0x1f]  }
 0x124   :  { %v1962_v63 = vmul.f32 -1.442695, %v2301_v62  ;;  %v2121_v4 = vpop.f32.mrb[7].mxu1 }
 0x125   :  { %2393 = vpow2.f32 %v1961_v60 }
 0x126   :  { %2395 = vpow2.f32 %v1962_v63  ;;  %v2847_v63 = vld [vmem:[%s3042_s2 + $0x38] sm:$0x1f]  }
 0x12f   :  { %v2394_v5 = vpop.eup %2393 }
 0x130   :  { %v469_v6 = vadd.f32 1.0, %v2394_v5  ;;  %v2396_v9 = vpop.eup %2395 }
 0x131   :  { %v476_v11 = vadd.f32 1.0, %v2396_v9 }
 0x132   :  { %2397 = vrcp.f32 %v469_v6 }
 0x133   :  { %2399 = vrcp.f32 %v476_v11 }
 0x13c   :  { %v2398_v13 = vpop.eup %2397 }
 0x13d   :  { %v479_v15 = vmul.f32 %v2398_v13, %v460_v12  ;;  %v2400_v17 = vpop.eup %2399 }
 0x13e   :  { %v482_v18 = vsub.f32 1.0, %v2400_v17  ;;  %v484_v21 = vmul.f32 %v2400_v17, %v2704_v27  ;;  %v611_v27 = vunpack.c.0.s8 %v610_v26 }
 0x13f   :  { %v480_v16 = vadd.f32 %v479_v15, %v201_v14 }
 0x140   :  { %v614_v28 = vsub.s32 %v611_v27, %v91_v45 }
 0x141   :  { %2401 = vtanh.f32 %v480_v16 }
 0x14b   :  { %v2402_v19 = vpop.eup %2401 }
 0x14c   :  { %v483_v20 = vmul.f32 %v2402_v19, %v482_v18 }
 0x14e   :  { %v485_v22 = vadd.f32 %v484_v21, %v483_v20 }
 0x150   :  { %v2769_v23 = vpack.c.bf16 %v485_v22, %v485_v22  ;;  %1911 = vst [vmem:[%s3054_s14] sm:$0xff] %v485_v22 }
 0x152   :  { %2139 = vmatmul.mubr.bf16.vlgmr.msra.gmra.mrb[4].mxu0 %v2769_v23 }
 0x153   :  { %2192 = vmatprep.mubr.msk.bf16.mxu0 %vm2521_vm0, %v2520_v1 }
 0x225   :  { %v601_v29 = vpop.f32.mrb[4].mxu0 }
 0x226   :  { %v607_v30 = vpack.c.bf16 %v601_v29, %v601_v29  ;;  %v2140_v31 = vpop.f32.mrb[5].mxu0 }
 0x227   :  { %v604_v32 = vpop.f32.mrb[6].mxu0 }
 0x228   :  { %v615_v33 = vrot.slane %v607_v30, %v614_v28  ;;  %v2141_v34 = vpop.f32.mrb[7].mxu0 }
 0x22a   :  { %v623_v35 = vrot.slane %v615_v33, %v614_v28  ;;  %v616_v40 = vcombine.high %v615_v33, %v615_v33 }
 0x22c   :  { %v1971_v36 = vpack.i.b16 %v623_v35, %v623_v35  ;;  %v634_v38 = vunpack.i.h.s16 %v623_v35  ;;  %v630_v43 = vrot.slane %v616_v40, %v614_v28  ;;  %v631_v52 = vcombine.high %v623_v35, %v623_v35 }
 0x22e   :  { %v645_v39 = vrot.slane %v1971_v36, %v2758_v46  ;;  %v693_v41 = vpack.i.b16 %v634_v38, %v634_v38  ;;  %v1974_v45 = vpack.i.b16 %v630_v43, %v630_v43  ;;  %v636_v49 = vunpack.i.h.s16 %v630_v43 }
 0x22f   :  { %v1977_v54 = vpack.i.b16 %v631_v52, %v631_v52  ;;  %v638_v57 = vunpack.i.h.s16 %v631_v52  ;;  %v632_v60 = vcombine.high %v630_v43, %v630_v43 }
 0x230   :  { %2145 = vmatmul.mubr.bf16.vlgmr.msra.gmra.mrb[8].mxu1 %v645_v39  ;;  %v697_v44 = vrot.slane %v693_v41, %v2758_v46  ;;  %v749_v48 = vrot.slane %v1974_v45, %v2758_v46  ;;  %v797_v50 = vpack.i.b16 %v636_v49, %v636_v49 }
 0x231   :  { %2149 = vmatpush3.bf16.xpose.msra.mxu1 %v2787_v37  ;;  %2150 = vmatprep.mubr.msk.bf16.mxu1 %vm2521_vm0, %v2520_v1  ;;  %v853_v56 = vrot.slane %v1977_v54, %v2758_v46  ;;  %v901_v58 = vpack.i.b16 %v638_v57, %v638_v57  ;;  %v1980_v62 = vpack.i.b16 %v632_v60, %v632_v60  ;;  %v640_v2 = vunpack.i.h.s16 %v632_v60 }
 0x232   :  { %2154 = vmatprep.subr.bf16.mxu1 %v2520_v1  ;;  %v801_v53 = vrot.slane %v797_v50, %v2758_v46 }
 0x233   :  { %v905_v61 = vrot.slane %v901_v58, %v2758_v46  ;;  %v957_v0 = vrot.slane %v1980_v62, %v2758_v46  ;;  %v1005_v3 = vpack.i.b16 %v640_v2, %v640_v2 }
 0x235   :  { %v1009_v4 = vrot.slane %v1005_v3, %v2758_v46 }
 0x238   :  { %2151 = vmatmul.mubr.bf16.vlgmr.msra.gmra.mrb[12].mxu1 %v697_v44 }
 0x239   :  { %2155 = vmatpush3.bf16.xpose.msra.mxu1 %v2797_v42  ;;  %2156 = vmatprep.mubr.msk.bf16.mxu1 %vm2521_vm0, %v2520_v1 }
 0x23a   :  { %2160 = vmatprep.subr.bf16.mxu1 %v2520_v1 }
 0x240   :  { %2157 = vmatmul.mubr.bf16.vlgmr.msra.gmra.mrb[16].mxu1 %v749_v48 }
 0x241   :  { %2161 = vmatpush3.bf16.xpose.msra.mxu1 %v2807_v47  ;;  %2162 = vmatprep.mubr.msk.bf16.mxu1 %vm2521_vm0, %v2520_v1 }
 0x242   :  { %2166 = vmatprep.subr.bf16.mxu1 %v2520_v1 }
 0x248   :  { %2163 = vmatmul.mubr.bf16.vlgmr.msra.gmra.mrb[20].mxu1 %v801_v53 }
 0x249   :  { %2167 = vmatpush3.bf16.xpose.msra.mxu1 %v2817_v51  ;;  %2168 = vmatprep.mubr.msk.bf16.mxu1 %vm2521_vm0, %v2520_v1 }
 0x24a   :  { %2172 = vmatprep.subr.bf16.mxu1 %v2520_v1 }
 0x250   :  { %2169 = vmatmul.mubr.bf16.vlgmr.msra.gmra.mrb[24].mxu1 %v853_v56 }
 0x251   :  { %2173 = vmatpush3.bf16.xpose.msra.mxu1 %v2827_v55  ;;  %2174 = vmatprep.mubr.msk.bf16.mxu1 %vm2521_vm0, %v2520_v1 }
 0x252   :  { %2178 = vmatprep.subr.bf16.mxu1 %v2520_v1 }
 0x258   :  { %2175 = vmatmul.mubr.bf16.vlgmr.msra.gmra.mrb[28].mxu1 %v905_v61 }
 0x259   :  { %2179 = vmatpush3.bf16.xpose.msra.mxu1 %v2837_v59  ;;  %2180 = vmatprep.mubr.msk.bf16.mxu1 %vm2521_vm0, %v2520_v1 }
 0x25a   :  { %2184 = vmatprep.subr.bf16.mxu1 %v2520_v1 }
 0x260   :  { %2181 = vmatmul.mubr.bf16.vlgmr.msra.gmra.mrb[32].mxu1 %v957_v0 }
 0x261   :  { %2185 = vmatpush3.bf16.xpose.msra.mxu1 %v2847_v63  ;;  %2186 = vmatprep.mubr.msk.bf16.mxu1 %vm2521_vm0, %v2520_v1 }
 0x262   :  { %2196 = vmatprep.subr.bf16.mxu1 %v2520_v1 }
 0x268   :  { %2187 = vmatmul.mubr.bf16.vlgmr.msra.gmra.mrb[36].mxu1 %v1009_v4 }
 0x269   :  { %2198 = vmatprep.mubr.msk.bf16.mxu1 %vm2521_vm0, %v2520_v1 }
 0x303   :  { %v687_v5 = vpop.f32.mrb[8].mxu1 }
 0x304   :  { %v2146_v6 = vpop.f32.mrb[9].mxu1  ;;  %v1058_v7 = vsel %vm1057_vm2, %v687_v5, -inf }
 0x305   :  { %1059 = vmax.xlane.f32.xlu0 %v1058_v7  ;;  %v690_v8 = vpop.f32.mrb[10].mxu1 }
 0x306   :  { %v2147_v9 = vpop.f32.mrb[11].mxu1 }
 0x30b   :  { %v739_v10 = vpop.f32.mrb[12].mxu1 }
 0x30c   :  { %v2152_v11 = vpop.f32.mrb[13].mxu1  ;;  %v1061_v12 = vsel %vm1057_vm2, %v739_v10, -inf }
 0x30d   :  { %1062 = vmax.xlane.f32.xlu0 %v1061_v12  ;;  %v742_v13 = vpop.f32.mrb[14].mxu1 }
 0x30e   :  { %v2153_v14 = vpop.f32.mrb[15].mxu1 }
 0x313   :  { %v791_v46 = vpop.f32.mrb[16].mxu1 }
 0x314   :  { %v2158_v15 = vpop.f32.mrb[17].mxu1  ;;  %v1064_v16 = vsel %vm1057_vm2, %v791_v46, -inf }
 0x315   :  { %1065 = vmax.xlane.f32.xlu1 %v1064_v16  ;;  %v794_v17 = vpop.f32.mrb[18].mxu1  ;;  %v1160_v16 = vsel %vm1158_vm3, %v2780_v24, 0 }
 0x316   :  { %v2159_v18 = vpop.f32.mrb[19].mxu1  ;;  %2191 = vmatpush3.bf16.msra.mxu0 %v1160_v16  ;;  %v2377_v16 = vld [vmem:[%s3049_s9] sm:$0xff]  }
 0x317   :  { %2202 = vmatprep.subr.bf16.mxu0 %v2520_v1 }
 0x31b   :  { %v843_v19 = vpop.f32.mrb[20].mxu1 }
 0x31c   :  { %v2164_v20 = vpop.f32.mrb[21].mxu1  ;;  %v1067_v21 = vsel %vm1057_vm2, %v843_v19, -inf }
 0x31d   :  { %1068 = vmax.xlane.f32.xlu1 %v1067_v21  ;;  %v846_v22 = vpop.f32.mrb[22].mxu1 }
 0x31e   :  { %v2165_v25 = vpop.f32.mrb[23].mxu1  ;;  %v1206_v22 = vsel %vm1158_vm3, %v2787_v37, 0 }
 0x31f   :  { %2197 = vmatpush3.bf16.msra.mxu1 %v1206_v22  ;;  %v2384_v22 = vld [vmem:[%s3049_s9 + $0x38] sm:$0xff]  }
 0x320   :  { %2208 = vmatprep.subr.bf16.mxu1 %v2520_v1 }
 0x323   :  { %v895_v26 = vpop.f32.mrb[24].mxu1 }
 0x324   :  { %v2170_v27 = vpop.f32.mrb[25].mxu1  ;;  %v1070_v28 = vsel %vm1057_vm2, %v895_v26, -inf }
 0x325   :  { %1071 = vmax.xlane.f32.xlu0 %v1070_v28  ;;  %v898_v29 = vpop.f32.mrb[26].mxu1 }
 0x326   :  { %v2171_v30 = vpop.f32.mrb[27].mxu1 }
 0x32b   :  { %v947_v31 = vpop.f32.mrb[28].mxu1 }
 0x32c   :  { %v2176_v32 = vpop.f32.mrb[29].mxu1  ;;  %v1073_v33 = vsel %vm1057_vm2, %v947_v31, -inf }
 0x32d   :  { %1074 = vmax.xlane.f32.xlu1 %v1073_v33  ;;  %v950_v34 = vpop.f32.mrb[30].mxu1 }
 0x32e   :  { %v2177_v35 = vpop.f32.mrb[31].mxu1 }
 0x333   :  { %v999_v36 = vpop.f32.mrb[32].mxu1 }
 0x334   :  { %v2182_v38 = vpop.f32.mrb[33].mxu1  ;;  %v1076_v39 = vsel %vm1057_vm2, %v999_v36, -inf }
 0x335   :  { %1077 = vmax.xlane.f32.xlu0 %v1076_v39  ;;  %v1002_v40 = vpop.f32.mrb[34].mxu1  ;;  %v1252_v38 = vsel %vm1158_vm3, %v2797_v42, 0 }
 0x336   :  { %v2183_v41 = vpop.f32.mrb[35].mxu1 }
 0x33b   :  { %v1051_v43 = vpop.f32.mrb[36].mxu1 }
 0x33c   :  { %v2188_v44 = vpop.f32.mrb[37].mxu1  ;;  %v1079_v45 = vsel %vm1057_vm2, %v1051_v43, -inf }
 0x33d   :  { %1080 = vmax.xlane.f32.xlu1 %v1079_v45  ;;  %v1054_v48 = vpop.f32.mrb[38].mxu1  ;;  %v1298_v44 = vsel %vm1158_vm3, %v2807_v47, 0 }
 0x33e   :  { %v2189_v49 = vpop.f32.mrb[39].mxu1 }
 0x392   :  { %v1060_v50 = vpop.xlane.xlu0 %1059 }
 0x393   :  { %v1082_v52 = vsub.f32 %v687_v5, %v1060_v50  ;;  %v1344_v50 = vsel %vm1158_vm3, %v2817_v51, 0 }
 0x395   :  { %v1090_v53 = vmul.f32 1.442695, %v1082_v52 }
 0x397   :  { %2403 = vpow2.f32 %v1090_v53 }
 0x39a   :  { %v1063_v54 = vpop.xlane.xlu0 %1062 }
 0x39b   :  { %v1083_v56 = vsub.f32 %v739_v10, %v1063_v54 }
 0x39d   :  { %v1092_v57 = vmul.f32 1.442695, %v1083_v56  ;;  %v1390_v56 = vsel %vm1158_vm3, %v2827_v55, 0 }
 0x39f   :  { %2405 = vpow2.f32 %v1092_v57 }
 0x3a1   :  { %v2404_v58 = vpop.eup %2403 }
 0x3a2   :  { %v1066_v60 = vpop.xlane.xlu1 %1065  ;;  %v1106_v61 = vsel %vm1057_vm2, %v2404_v58, 0.0 }
 0x3a3   :  { %v1084_v62 = vsub.f32 %v791_v46, %v1066_v60  ;;  %1107 = vadd.xlane.f32.xlu0 %v1106_v61  ;;  %v1436_v61 = vsel %vm1158_vm3, %v2837_v59, 0 }
 0x3a5   :  { %v1094_v0 = vmul.f32 1.442695, %v1084_v62 }
 0x3a7   :  { %2407 = vpow2.f32 %v1094_v0 }
 0x3a9   :  { %v2866_v2 = vpop.eup %2405 }
 0x3aa   :  { %v1069_v3 = vpop.xlane.xlu1 %1068  ;;  %v1109_v4 = vsel %vm1057_vm2, %v2866_v2, 0.0 }
 0x3ab   :  { %v1085_v5 = vsub.f32 %v843_v19, %v1069_v3  ;;  %1110 = vadd.xlane.f32.xlu1 %v1109_v4  ;;  %v1482_v3 = vsel %vm1158_vm3, %v2847_v63, 0 }
 0x3ad   :  { %v1096_v6 = vmul.f32 1.442695, %v1085_v5 }
 0x3af   :  { %2409 = vpow2.f32 %v1096_v6 }
 0x3b1   :  { %v2870_v7 = vpop.eup %2407 }
 0x3b2   :  { %v1072_v8 = vpop.xlane.xlu0 %1071  ;;  %v1112_v9 = vsel %vm1057_vm2, %v2870_v7, 0.0 }
 0x3b3   :  { %v1086_v10 = vsub.f32 %v895_v26, %v1072_v8  ;;  %1113 = vadd.xlane.f32.xlu0 %v1112_v9  ;;  %v2369_v8 = vld [vmem:[%s3048_s8] sm:$0xff]  }
 0x3b5   :  { %v1098_v11 = vmul.f32 1.442695, %v1086_v10  ;;  %v2370_v10 = vld [vmem:[%s3048_s8 + $0x8] sm:$0xff]  }
 0x3b7   :  { %2411 = vpow2.f32 %v1098_v11  ;;  %v2371_v11 = vld [vmem:[%s3048_s8 + $0x10] sm:$0xff]  }
 0x3b9   :  { %v2874_v12 = vpop.eup %2409 }
 0x3ba   :  { %v1075_v13 = vpop.xlane.xlu1 %1074  ;;  %v1115_v14 = vsel %vm1057_vm2, %v2874_v12, 0.0 }
 0x3bb   :  { %v1087_v46 = vsub.f32 %v947_v31, %v1075_v13  ;;  %1116 = vadd.xlane.f32.xlu1 %v1115_v14  ;;  %v2373_v13 = vld [vmem:[%s3048_s8 + $0x20] sm:$0xff]   ;;  %v2374_v14 = vld [vmem:[%s3048_s8 + $0x28] sm:$0xff]  }
 0x3bd   :  { %v1100_v15 = vmul.f32 1.442695, %v1087_v46  ;;  %v2375_v46 = vld [vmem:[%s3048_s8 + $0x30] sm:$0xff]  }
 0x3bf   :  { %2413 = vpow2.f32 %v1100_v15  ;;  %v2376_v15 = vld [vmem:[%s3048_s8 + $0x38] sm:$0xff]  }
 0x3c1   :  { %v2881_v17 = vpop.eup %2411 }
 0x3c2   :  { %v1078_v18 = vpop.xlane.xlu0 %1077  ;;  %v1118_v19 = vsel %vm1057_vm2, %v2881_v17, 0.0 }
 0x3c3   :  { %v1088_v20 = vsub.f32 %v999_v36, %v1078_v18  ;;  %1119 = vadd.xlane.f32.xlu0 %v1118_v19  ;;  %v2379_v18 = vld [vmem:[%s3049_s9 + $0x10] sm:$0xff]   ;;  %v2381_v19 = vld [vmem:[%s3049_s9 + $0x20] sm:$0xff]  }
 0x3c5   :  { %v1102_v21 = vmul.f32 1.442695, %v1088_v20  ;;  %v2382_v20 = vld [vmem:[%s3049_s9 + $0x28] sm:$0xff]  }
 0x3c7   :  { %2415 = vpow2.f32 %v1102_v21  ;;  %v2383_v21 = vld [vmem:[%s3049_s9 + $0x30] sm:$0xff]  }
 0x3c9   :  { %v2888_v24 = vpop.eup %2413 }
 0x3ca   :  { %v1081_v25 = vpop.xlane.xlu1 %1080  ;;  %v1121_v26 = vsel %vm1057_vm2, %v2888_v24, 0.0 }
 0x3cb   :  { %v1089_v27 = vsub.f32 %v1051_v43, %v1081_v25  ;;  %1122 = vadd.xlane.f32.xlu1 %v1121_v26 }
 0x3cd   :  { %v1104_v28 = vmul.f32 1.442695, %v1089_v27 }
 0x3cf   :  { %2417 = vpow2.f32 %v1104_v28 }
 0x3d1   :  { %v2892_v29 = vpop.eup %2415 }
 0x3d2   :  { %v1124_v30 = vsel %vm1057_vm2, %v2892_v29, 0.0 }
 0x3d3   :  { %1125 = vadd.xlane.f32.xlu0 %v1124_v30 }
 0x3d9   :  { %v2896_v37 = vpop.eup %2417 }
 0x3da   :  { %v1127_v31 = vsel %vm1057_vm2, %v2896_v37, 0.0 }
 0x3db   :  { %1128 = vadd.xlane.f32.xlu1 %v1127_v31 }
 0x430   :  { %v1108_v32 = vpop.xlane.xlu0 %1107 }
 0x431   :  { %2419 = vrcp.f32 %v1108_v32 }
 0x438   :  { %v1111_v33 = vpop.xlane.xlu1 %1110 }
 0x439   :  { %2421 = vrcp.f32 %v1111_v33 }
 0x43b   :  { %v2420_v34 = vpop.eup %2419 }
 0x43c   :  { %v1138_v35 = vmul.f32 %v2420_v34, %v2404_v58 }
 0x43e   :  { %v1146_v36 = vpack.c.bf16 %v1138_v35, %v1138_v35 }
 0x440   :  { %2193 = vmatmul.mubr.msk.bf16.vlgmr.msra.gmra.mrb[8].mxu0 %vm1154_vm4, %v1146_v36  ;;  %v1114_v39 = vpop.xlane.xlu0 %1113 }
 0x441   :  { %2423 = vrcp.f32 %v1114_v39  ;;  %2203 = vmatpush3.bf16.msra.mxu0 %v1252_v38  ;;  %2204 = vmatprep.mubr.msk.bf16.mxu0 %vm2521_vm0, %v2520_v1 }
 0x442   :  { %2214 = vmatprep.subr.bf16.mxu0 %v2520_v1 }
 0x443   :  { %v2422_v40 = vpop.eup %2421 }
 0x444   :  { %v1139_v41 = vmul.f32 %v2422_v40, %v2866_v2 }
 0x446   :  { %v1147_v43 = vpack.c.bf16 %v1139_v41, %v1139_v41 }
 0x448   :  { %2199 = vmatmul.mubr.msk.bf16.vlgmr.msra.gmra.mrb[40].mxu1 %vm1154_vm4, %v1147_v43  ;;  %v1117_v42 = vpop.xlane.xlu1 %1116 }
 0x449   :  { %2425 = vrcp.f32 %v1117_v42  ;;  %2209 = vmatpush3.bf16.msra.mxu1 %v1298_v44  ;;  %2210 = vmatprep.mubr.msk.bf16.mxu1 %vm2521_vm0, %v2520_v1 }
 0x44a   :  { %2220 = vmatprep.subr.bf16.mxu1 %v2520_v1 }
 0x44b   :  { %v2424_v45 = vpop.eup %2423 }
 0x44c   :  { %v1140_v48 = vmul.f32 %v2424_v45, %v2870_v7 }
 0x44e   :  { %v1148_v49 = vpack.c.bf16 %v1140_v48, %v1140_v48 }
 0x450   :  { %2205 = vmatmul.mubr.msk.bf16.vlgmr.msra.gmra.mrb[12].mxu0 %vm1154_vm4, %v1148_v49  ;;  %v1120_v47 = vpop.xlane.xlu0 %1119 }
 0x451   :  { %2427 = vrcp.f32 %v1120_v47  ;;  %2215 = vmatpush3.bf16.msra.mxu0 %v1344_v50  ;;  %2216 = vmatprep.mubr.msk.bf16.mxu0 %vm2521_vm0, %v2520_v1 }
 0x452   :  { %2226 = vmatprep.subr.bf16.mxu0 %v2520_v1 }
 0x453   :  { %v2426_v52 = vpop.eup %2425 }
 0x454   :  { %v1141_v53 = vmul.f32 %v2426_v52, %v2874_v12  ;;  %v2372_v12 = vld [vmem:[%s3048_s8 + $0x18] sm:$0xff]  }
 0x456   :  { %v1149_v54 = vpack.c.bf16 %v1141_v53, %v1141_v53 }
 0x458   :  { %2211 = vmatmul.mubr.msk.bf16.vlgmr.msra.gmra.mrb[44].mxu1 %vm1154_vm4, %v1149_v54  ;;  %v1123_v51 = vpop.xlane.xlu1 %1122 }
 0x459   :  { %2429 = vrcp.f32 %v1123_v51  ;;  %2221 = vmatpush3.bf16.msra.mxu1 %v1390_v56  ;;  %2222 = vmatprep.mubr.msk.bf16.mxu1 %vm2521_vm0, %v2520_v1 }
 0x45a   :  { %2232 = vmatprep.subr.bf16.mxu1 %v2520_v1 }
 0x45b   :  { %v2428_v57 = vpop.eup %2427 }
 0x45c   :  { %v1142_v58 = vmul.f32 %v2428_v57, %v2881_v17  ;;  %v2378_v17 = vld [vmem:[%s3049_s9 + $0x8] sm:$0xff]  }
 0x45e   :  { %v1150_v60 = vpack.c.bf16 %v1142_v58, %v1142_v58 }
 0x460   :  { %2217 = vmatmul.mubr.msk.bf16.vlgmr.msra.gmra.mrb[16].mxu0 %vm1154_vm4, %v1150_v60  ;;  %v1126_v55 = vpop.xlane.xlu0 %1125 }
 0x461   :  { %2431 = vrcp.f32 %v1126_v55  ;;  %2227 = vmatpush3.bf16.msra.mxu0 %v1436_v61  ;;  %2228 = vmatprep.mubr.msk.bf16.mxu0 %vm2521_vm0, %v2520_v1 }
 0x462   :  { %2238 = vmatprep.subr.bf16.mxu0 %v2520_v1 }
 0x463   :  { %v2430_v62 = vpop.eup %2429 }
 0x464   :  { %v1143_v0 = vmul.f32 %v2430_v62, %v2888_v24 }
 0x466   :  { %v1151_v2 = vpack.c.bf16 %v1143_v0, %v1143_v0 }
 0x468   :  { %2223 = vmatmul.mubr.msk.bf16.vlgmr.msra.gmra.mrb[48].mxu1 %vm1154_vm4, %v1151_v2  ;;  %v1129_v59 = vpop.xlane.xlu1 %1128 }
 0x469   :  { %2433 = vrcp.f32 %v1129_v59  ;;  %2233 = vmatpush3.bf16.msra.mxu1 %v1482_v3  ;;  %2234 = vmatprep.mubr.msk.bf16.mxu1 %vm2521_vm0, %v2520_v1 }
 0x46a   :  { %2258 = vmatprep.subr.bf16.mxu1 %v2520_v1 }
 0x46b   :  { %v2432_v4 = vpop.eup %2431 }
 0x46c   :  { %v1144_v5 = vmul.f32 %v2432_v4, %v2892_v29 }
 0x46e   :  { %v1152_v6 = vpack.c.bf16 %v1144_v5, %v1144_v5 }
 0x470   :  { %2229 = vmatmul.mubr.msk.bf16.vlgmr.msra.gmra.mrb[20].mxu0 %vm1154_vm4, %v1152_v6 }
 0x471   :  { %2254 = vmatprep.mubr.msk.bf16.mxu0 %vm2521_vm0, %v2520_v1  ;;  %2239 = vmatpush3.bf16.msra.mxu0 %v2377_v16 }
 0x472   :  { %2240 = vmatprep.subr.bf16.mxu0 %v2520_v1 }
 0x473   :  { %v2434_v63 = vpop.eup %2433 }
 0x474   :  { %v1145_v7 = vmul.f32 %v2434_v63, %v2896_v37 }
 0x475   :  { %2241 = vmatpush3.bf16.msra.mxu0 %v2378_v17 }
 0x476   :  { %v1153_v9 = vpack.c.bf16 %v1145_v7, %v1145_v7  ;;  %2242 = vmatprep.subr.bf16.mxu0 %v2520_v1 }
 0x478   :  { %2235 = vmatmul.mubr.msk.bf16.vlgmr.msra.gmra.mrb[52].mxu1 %vm1154_vm4, %v1153_v9 }
 0x479   :  { %2259 = vmatpush3.bf16.msra.mxu1 %v2369_v8  ;;  %2274 = vmatprep.mubr.msk.bf16.mxu1 %vm2521_vm0, %v2520_v1 }
 0x47a   :  { %2260 = vmatprep.subr.bf16.mxu1 %v2520_v1  ;;  %2243 = vmatpush3.bf16.msra.mxu0 %v2379_v18 }
 0x47b   :  { %2244 = vmatprep.subr.bf16.mxu0 %v2520_v1 }
 0x47d   :  { %2261 = vmatpush3.bf16.msra.mxu1 %v2370_v10 }
 0x47e   :  { %2262 = vmatprep.subr.bf16.mxu1 %v2520_v1 }
 0x481   :  { %2263 = vmatpush3.bf16.msra.mxu1 %v2371_v11 }
 0x482   :  { %2264 = vmatprep.subr.bf16.mxu1 %v2520_v1 }
 0x485   :  { %2265 = vmatpush3.bf16.msra.mxu1 %v2372_v12 }
 0x486   :  { %2266 = vmatprep.subr.bf16.mxu1 %v2520_v1 }
 0x489   :  { %2267 = vmatpush3.bf16.msra.mxu1 %v2373_v13 }
 0x48a   :  { %2268 = vmatprep.subr.bf16.mxu1 %v2520_v1 }
 0x48d   :  { %2269 = vmatpush3.bf16.msra.mxu1 %v2374_v14 }
 0x48e   :  { %2270 = vmatprep.subr.bf16.mxu1 %v2520_v1 }
 0x491   :  { %2271 = vmatpush3.bf16.msra.mxu1 %v2375_v46 }
 0x492   :  { %2272 = vmatprep.subr.bf16.mxu1 %v2520_v1 }
 0x495   :  { %2273 = vmatpush3.bf16.msra.mxu1 %v2376_v15 }
 0x498   :  { %2275 = vmatmul.mubr.bf16.vlgmr.msra.gmra.mrb[56].mxu1 %v2769_v23  ;;  %v2380_v23 = vld [vmem:[%s3049_s9 + $0x18] sm:$0xff]  }
 0x499   :  { %2245 = vmatpush3.bf16.msra.mxu0 %v2380_v23 }
 0x49a   :  { %2246 = vmatprep.subr.bf16.mxu0 %v2520_v1 }
 0x49d   :  { %2247 = vmatpush3.bf16.msra.mxu0 %v2381_v19 }
 0x49e   :  { %2248 = vmatprep.subr.bf16.mxu0 %v2520_v1 }
 0x4a1   :  { %2249 = vmatpush3.bf16.msra.mxu0 %v2382_v20 }
 0x4a2   :  { %2250 = vmatprep.subr.bf16.mxu0 %v2520_v1 }
 0x4a5   :  { %2251 = vmatpush3.bf16.msra.mxu0 %v2383_v21 }
 0x4a6   :  { %2252 = vmatprep.subr.bf16.mxu0 %v2520_v1 }
 0x4a9   :  { %2253 = vmatpush3.bf16.msra.mxu0 %v2384_v22  ;;  %v2385_v22 = vld [vmem:[#allocation6] sm:$0xff]  }
 0x4aa   :  { %2278 = vmatprep.subr.bf16.mxu0 %v2520_v1 }
 0x513   :  { %v1196_v24 = vpop.f32.mrb[8].mxu0 }
 0x514   :  { %v2194_v25 = vpop.f32.mrb[9].mxu0  ;;  %v1556_v29 = vpack.c.bf16 %v1196_v24, %v1196_v24 }
 0x515   :  { %v1199_v26 = vpop.f32.mrb[10].mxu0  ;;  %v2386_v25 = vld [vmem:[#allocation6 + $0x8] sm:$0xff]  }
 0x516   :  { %v2195_v27 = vpop.f32.mrb[11].mxu0  ;;  %v1572_v34 = vunpack.c.l.b16 %v1556_v29  ;;  %v2387_v26 = vld [vmem:[#allocation6 + $0x10] sm:$0xff]  }
 0x517   :  { %v2388_v27 = vld [vmem:[#allocation6 + $0x18] sm:$0xff]  }
 0x51b   :  { %v1242_v28 = vpop.f32.mrb[40].mxu1 }
 0x51c   :  { %v1557_v30 = vpack.c.bf16 %v1242_v28, %v1242_v28  ;;  %v2200_v37 = vpop.f32.mrb[41].mxu1 }
 0x51d   :  { %v1245_v31 = vpop.f32.mrb[42].mxu1 }
 0x51e   :  { %v1573_v32 = vunpack.c.l.b16 %v1557_v30  ;;  %v2201_v33 = vpop.f32.mrb[43].mxu1  ;;  %v2389_v31 = vld [vmem:[#allocation6 + $0x20] sm:$0xff]  }
 0x51f   :  { %v2391_v33 = vld [vmem:[#allocation6 + $0x30] sm:$0xff]  }
 0x520   :  { %v1580_v35 = vrot.slane %v1573_v32, 7  ;;  %v2390_v32 = vld [vmem:[#allocation6 + $0x28] sm:$0xff]  }
 0x522   :  { %v1582_v36 = vsel %vm1581_vm5, %v1580_v35, %v1572_v34  ;;  %v2392_v34 = vld [vmem:[#allocation6 + $0x38] sm:$0xff]  }
 0x523   :  { %v1288_v38 = vpop.f32.mrb[12].mxu0 }
 0x524   :  { %v1558_v39 = vpack.c.bf16 %v1288_v38, %v1288_v38  ;;  %v2206_v40 = vpop.f32.mrb[13].mxu0 }
 0x525   :  { %v1291_v41 = vpop.f32.mrb[14].mxu0 }
 0x526   :  { %v1574_v43 = vunpack.c.l.b16 %v1558_v39  ;;  %v2207_v44 = vpop.f32.mrb[15].mxu0 }
 0x528   :  { %v1583_v42 = vrot.slane %v1574_v43, 6 }
 0x52a   :  { %v1585_v45 = vsel %vm1584_vm6, %v1583_v42, %v1582_v36  ;;  %v2007_v36 = vld [vmem:[%s3050_s10] ss:$0 sm:$0xff]  ;;  %s2523_s10 = smov [#allocation8]  }
 0x52b   :  { %v1334_v48 = vpop.f32.mrb[44].mxu1  ;;  %s1918_s5 = sshll.u32 %s2523_s10, 4  ;;  %s1919_s5 = int_to_ptr.vmem [resolvable:$true] %s1918_s5 }
 0x52c   :  { %v1559_v49 = vpack.c.bf16 %v1334_v48, %v1334_v48  ;;  %v2212_v50 = vpop.f32.mrb[45].mxu1  ;;  %p2490_p3 = scmp.lt.s32.totalorder %s1919_s5, %s1919_s5 }
 0x52d   :  { %v1337_v47 = vpop.f32.mrb[46].mxu1 }
 0x52e   :  { %v1575_v52 = vunpack.c.l.b16 %v1559_v49  ;;  %v2213_v53 = vpop.f32.mrb[47].mxu1 }
 0x530   :  { %v1586_v54 = vrot.slane %v1575_v52, 5 }
 0x532   :  { %v1588_v56 = vsel %vm1587_vm7, %v1586_v54, %v1585_v45 }
 0x533   :  { %v1380_v51 = vpop.f32.mrb[16].mxu0 }
 0x534   :  { %v1560_v57 = vpack.c.bf16 %v1380_v51, %v1380_v51  ;;  %v2218_v58 = vpop.f32.mrb[17].mxu0 }
 0x535   :  { %v1383_v60 = vpop.f32.mrb[18].mxu0 }
 0x536   :  { %v1576_v61 = vunpack.c.l.b16 %v1560_v57  ;;  %v2219_v55 = vpop.f32.mrb[19].mxu0 }
 0x538   :  { %v1589_v62 = vrot.slane %v1576_v61, 4 }
 0x53a   :  { %v1591_v0 = vsel %vm1590_vm8, %v1589_v62, %v1588_v56 }
 0x53b   :  { %v1426_v2 = vpop.f32.mrb[48].mxu1 }
 0x53c   :  { %v1561_v3 = vpack.c.bf16 %v1426_v2, %v1426_v2  ;;  %v2224_v59 = vpop.f32.mrb[49].mxu1 }
 0x53d   :  { %v1429_v4 = vpop.f32.mrb[50].mxu1 }
 0x53e   :  { %v1577_v5 = vunpack.c.l.b16 %v1561_v3  ;;  %v2225_v6 = vpop.f32.mrb[51].mxu1 }
 0x540   :  { %v1592_v63 = vrot.slane %v1577_v5, 3 }
 0x542   :  { %v1594_v7 = vsel %vm1593_vm9, %v1592_v63, %v1591_v0 }
 0x543   :  { %v1472_v8 = vpop.f32.mrb[20].mxu0 }
 0x544   :  { %v1562_v9 = vpack.c.bf16 %v1472_v8, %v1472_v8  ;;  %v2230_v10 = vpop.f32.mrb[21].mxu0 }
 0x545   :  { %v1475_v11 = vpop.f32.mrb[22].mxu0 }
 0x546   :  { %v1578_v12 = vunpack.c.l.b16 %v1562_v9  ;;  %v2231_v13 = vpop.f32.mrb[23].mxu0 }
 0x548   :  { %v1595_v14 = vrot.slane %v1578_v12, 2 }
 0x54a   :  { %v1597_v46 = vsel %vm1596_vm10, %v1595_v14, %v1594_v7 }
 0x54b   :  { %v1518_v15 = vpop.f32.mrb[52].mxu1 }
 0x54c   :  { %v1563_v16 = vpack.c.bf16 %v1518_v15, %v1518_v15  ;;  %v2236_v17 = vpop.f32.mrb[53].mxu1 }
 0x54d   :  { %v1521_v18 = vpop.f32.mrb[54].mxu1 }
 0x54e   :  { %v1579_v23 = vunpack.c.l.b16 %v1563_v16  ;;  %v2237_v19 = vpop.f32.mrb[55].mxu1 }
 0x550   :  { %v1598_v20 = vrot.slane %v1579_v23, 1 }
 0x552   :  { %v1600_v21 = vsel %vm1599_vm11, %v1598_v20, %v1597_v46 }
 0x553   :  { %v1601_v24 = vpack.c.b16 %v1600_v21, %v1600_v21 }
 0x555   :  { %2255 = vmatmul.mubr.bf16.vlgmr.msra.gmra.mrb[24].mxu0 %v1601_v24 }
 0x556   :  { %2279 = vmatpush3.bf16.msra.mxu0 %v2385_v22  ;;  %2294 = vmatprep.mubr.msk.bf16.mxu0 %vm2521_vm0, %v2520_v1 }
 0x557   :  { %2280 = vmatprep.subr.bf16.mxu0 %v2520_v1 }
 0x55a   :  { %2281 = vmatpush3.bf16.msra.mxu0 %v2386_v25 }
 0x55b   :  { %2282 = vmatprep.subr.bf16.mxu0 %v2520_v1 }
 0x55e   :  { %2283 = vmatpush3.bf16.msra.mxu0 %v2387_v26 }
 0x55f   :  { %2284 = vmatprep.subr.bf16.mxu0 %v2520_v1 }
 0x562   :  { %2285 = vmatpush3.bf16.msra.mxu0 %v2388_v27 }
 0x563   :  { %2286 = vmatprep.subr.bf16.mxu0 %v2520_v1 }
 0x566   :  { %2287 = vmatpush3.bf16.msra.mxu0 %v2389_v31 }
 0x567   :  { %2288 = vmatprep.subr.bf16.mxu0 %v2520_v1 }
 0x56a   :  { %2289 = vmatpush3.bf16.msra.mxu0 %v2390_v32 }
 0x56b   :  { %v1773_v28 = vpop.f32.mrb[56].mxu1  ;;  %2290 = vmatprep.subr.bf16.mxu0 %v2520_v1 }
 0x56c   :  { %v2276_v29 = vpop.f32.mrb[57].mxu1 }
 0x56d   :  { %v1776_v30 = vpop.f32.mrb[58].mxu1 }
 0x56e   :  { %v2277_v37 = vpop.f32.mrb[59].mxu1  ;;  %2291 = vmatpush3.bf16.msra.mxu0 %v2391_v33 }
 0x56f   :  { %2292 = vmatprep.subr.bf16.mxu0 %v2520_v1  ;;  %v2008_v1 = vld [vmem:[%s3052_s12] ss:$0 sm:$0xff]  ;;  %s2485_s12 = scalar_lea.vmem %s1919_s5, 128 }
 0x570   :  { %p2486_p2 = scmp.ne.s32.totalorder %s1919_s5, %s2485_s12  ;;  %p2491_p4 = scmp.lt.s32.totalorder %s2485_s12, %s2485_s12 }
 0x572   :  { %2293 = vmatpush3.bf16.msra.mxu0 %v2392_v34  ;;  %p2492_p5 = por %p2491_p4, %p2490_p3 }
 0x574   :  { %p2493_p6 = pnand %p2492_p5, %p2486_p2 }
 0x628   :  { %v1685_v35 = vpop.f32.mrb[24].mxu0 }
 0x629   :  { %v1774_v38 = vadd.f32 %v1773_v28, %v1685_v35  ;;  %v2256_v39 = vpop.f32.mrb[25].mxu0 }
 0x62a   :  { %v1688_v40 = vpop.f32.mrb[26].mxu0 }
 0x62b   :  { %v1786_v41 = vadd.f32 %v2007_v36, %v1774_v38  ;;  %v2257_v43 = vpop.f32.mrb[27].mxu0 }
 0x62d   :  { %2435 = vtanh.f32 %v1786_v41 }
 0x637   :  { %v2436_v44 = vpop.eup %2435 }
 0x638   :  { %v1804_v42 = vpack.c.bf16 %v2436_v44, %v2436_v44 }
 0x63a   :  { %2295 = vmatmul.mubr.bf16.vlgmr.msra.gmra.mrb[28].mxu0 %v1804_v42 }
 0x70d   :  { %v1894_v45 = vpop.f32.mrb[28].mxu0 }
 0x70e   :  { %v1895_v48 = vadd.f32 %v2008_v1, %v1894_v45  ;;  %v2296_v49 = vpop.f32.mrb[29].mxu0 }
 0x70f   :  { %v1897_v50 = vpop.f32.mrb[30].mxu0 }
 0x710   :  { %1900 = vmax.xlane.f32.xlu0 %v1895_v48  ;;  %v2297_v47 = vpop.f32.mrb[31].mxu0 }
 0x79d   :  { %v1901_v52 = vpop.xlane.xlu0 %1900 }
 0x79e   :  { %v1902_v53 = vsub.f32 %v1895_v48, %v1901_v52 }
 0x7a0   :  { %v1903_v54 = vmul.f32 1.442695, %v1902_v53 }
 0x7a2   :  { %2437 = vpow2.f32 %v1903_v54 }
 0x7ac   :  { %v2438_v56 = vpop.eup %2437 }
 0x7ad   :  { %1905 = vadd.xlane.f32.xlu1 %v2438_v56 }
 0x83a   :  { %v1906_v51 = vpop.xlane.xlu1 %1905 }
 0x83b   :  { %2439 = vrcp.f32 %v1906_v51 }
 0x845   :  { %v2440_v57 = vpop.eup %2439 }
 0x846   :  { %v1908_v58 = vmul.f32 %v2440_v57, %v2438_v56 }
 0x848   :  { %1909 = vst [vmem:[#allocation8] sm:$0xff] %v1908_v58 }
 0x849   :  { %2496 = shalt.err (!%p2493_p6)
}
 0x84a   :  { %s2497_s0 = scalar_lea.hbm %s3053_s13, 128 }
 0x84b   :  { %p2498_p7 = scmp.ne.s32.totalorder %s3053_s13, %s2497_s0  ;;  %p2501_p8 = scmp.lt.u32.totalorder %s2497_s0, %s3053_s13 }
 0x84d   :  { %p2503_p9 = pnand %p2501_p8, %p2498_p7 }
 0x84f   :  { %2506 = shalt.err (!%p2503_p9)
}
 0x850   :  { %1921 = dma.vmem_to_hbm [thread:$0]  %s1919_s5, 128, %s3053_s13, [#allocation5]  }
 0x851   :  { %2511 = dma.done.wait [#allocation5], 128  }
 0x852   :  { %2512 = vsyncadd [#allocation5], 4294967168 }
 0x853   :  { %1929 = vsyncpa [#allocation4], 1 }
 0x854   :  { %1930 = vsyncpa [#allocation7], 1 }
 0x855   :  { %1931 = vsyncpa [#allocation5], 1 }

</bundles_post_ra>
